<compile_context>
chip_gen: v7x
topology: tpu7x:2x2x1
jax: 0.10.0
libtpu: 0.0.40
codegen_flags: <defaults>
</compile_context>

<pallas_src>
import math
import functools

import jax
import jax.numpy as jnp
from jax.experimental import pallas as pl
from jax.experimental.pallas import tpu as pltpu


# ----------------------------------------------------------------------------
# Fused kernel: 4x (GraphConvolution + ReLU) + Linear + softmax for Bt graphs.
# ----------------------------------------------------------------------------
def _make_fused_gcn_kernel(num_layers, compute_dtype):
    def kernel(*refs):
        x_ref, adj_ref = refs[0], refs[1]
        layer_refs = refs[2:2 + 2 * num_layers]
        wfc_ref, bfc_ref, o_ref, h_sc, hflat_sc = refs[2 + 2 * num_layers:]

        bt, n_nodes, _ = x_ref.shape
        adj = adj_ref[...].astype(compute_dtype)          # (Bt, N, N), resident all layers
        h = x_ref[...].astype(jnp.float32)                # (Bt, N, Fin) f32 carrier

        # ---- 4 GraphConvolution layers; h never leaves VMEM/vregs ----
        for li in range(num_layers):
            w_ref = layer_refs[2 * li]                    # (fin, fout), already compute_dtype
            b_ref = layer_refs[2 * li + 1]                # (1, fout), f32
            fin, fout = w_ref.shape
            w = w_ref[...]
            b = b_ref[...]
            hc = h.astype(compute_dtype)
            if fin <= fout:
                # (adj @ h) @ w : N^2 matmul contracts over the smaller feature dim.
                ah = jnp.einsum('bnm,bmf->bnf', adj, hc,
                                preferred_element_type=jnp.float32)
                ah2 = ah.astype(compute_dtype).reshape(bt * n_nodes, fin)  # leading-dim merge
                out = jnp.dot(ah2, w, preferred_element_type=jnp.float32)
                out = out.reshape(bt, n_nodes, fout)
            else:
                sup = jnp.dot(hc.reshape(bt * n_nodes, fin), w,
                              preferred_element_type=jnp.float32)
                sup = sup.astype(compute_dtype).reshape(bt, n_nodes, fout)
                out = jnp.einsum('bnm,bmo->bno', adj, sup,
                                 preferred_element_type=jnp.float32)
            h = jnp.maximum(out + b, 0.0)                 # f32 bias + ReLU epilogue

        # ---- FC: flatten (Bt, N, H4) -> (Bt, N*H4) through VMEM, then ONE matmul ----
        # (Mosaic dot_general can't contract two dims jointly, so the flatten relayout
        #  is an explicit copy loop; the matmul then has K = N*H4 and a single MXU op.)
        h4 = h.shape[-1]
        h_sc[...] = h.astype(compute_dtype)
        for n in range(n_nodes):
            hflat_sc[:, n * h4:(n + 1) * h4] = h_sc[:, n, :]
        logits = jnp.dot(hflat_sc[...], wfc_ref[...],
                         preferred_element_type=jnp.float32)
        logits = logits + bfc_ref[...]                    # padded classes carry bias = -1e30

        # ---- softmax over the (padded) class dim ----
        m = jnp.max(logits, axis=-1, keepdims=True)
        e = jnp.exp(logits - m)                           # padded columns underflow to 0
        denom = jnp.sum(e, axis=-1, keepdims=True)
        inv = pl.reciprocal(denom, approx=True)           # EUP slot
        inv = inv * (2.0 - denom * inv)                   # one Newton step -> ~f32 accuracy
        o_ref[...] = (e * inv).astype(o_ref.dtype)

    return kernel


# ----------------------------------------------------------------------------
# Helpers
# ----------------------------------------------------------------------------
def _round_up(x, m):
    return (x + m - 1) // m * m


def _pick_batch_tile(B):
    # Largest multiple-of-8 divisor of B (<= 64) leaving an EVEN grid of >= 2 steps
    # (shards across both v7x TensorCores); relax to >= 2 steps; else whole batch.
    def candidates(pred):
        return [bt for bt in range(8, min(B, 64) + 1, 8)
                if B % bt == 0 and pred(B // bt)]
    for pred in (lambda s: s >= 2 and s % 2 == 0, lambda s: s >= 2):
        cands = candidates(pred)
        if cands:
            return max(cands)
    return B


def _vmem_limit_bytes():
    # ~75% of physical VMEM: ~96 MiB on v5e/v6e (128 MiB), ~48 MiB on v7x (64 MiB).
    try:
        cap = pltpu.get_tpu_info().vmem_capacity_bytes
    except Exception:
        cap = 64 * 1024 * 1024
    return int(min(cap * 3 // 4, 112 * 1024 * 1024))


def pad_graph_nodes(x, adj, params, n_pad):
    """Zero-pad maxAtomNum to n_pad. Mathematically exact: zero adj rows/cols never feed
    real nodes and zero FC rows contribute nothing. Use to make N lane/sublane friendly
    (e.g. 132 -> 136/256 is avoided by capping real models at 128)."""
    B, N, F = x.shape
    assert n_pad >= N
    if n_pad == N:
        return x, adj, params
    dp = n_pad - N
    x_p = jnp.pad(x, ((0, 0), (0, dp), (0, 0)))
    adj_p = jnp.pad(adj, ((0, 0), (0, dp), (0, dp)))
    H4 = params["w4"].shape[1]
    C = params["w_fc"].shape[1]
    w_fc = params["w_fc"].reshape(N, H4, C)
    w_fc = jnp.pad(w_fc, ((0, dp), (0, 0), (0, 0))).reshape(n_pad * H4, C)
    params_p = dict(params)
    params_p["w_fc"] = w_fc
    return x_p, adj_p, params_p


# ----------------------------------------------------------------------------
# Wrapper
# ----------------------------------------------------------------------------
@functools.partial(jax.jit, static_argnames=("batch_tile", "compute_dtype"))
def gcn_forward(x, adj, params, *, batch_tile=None, compute_dtype=jnp.float32):
    """x: [B,N,Fin], adj: [B,N,N] -> class probabilities [B, C]."""
    B, N, Fin = x.shape
    num_layers = 4
    H4 = params["w4"].shape[1]
    C = params["w_fc"].shape[1]
    D = N * H4
    assert params["w_fc"].shape[0] == D

    Bt = _pick_batch_tile(B) if batch_tile is None else batch_tile
    assert B % Bt == 0, (B, Bt)

    # Lane-dense FC: zero-pad classes to a multiple of 128; padded bias columns are
    # -1e30 so exp() underflows to 0 and the softmax over real classes is unchanged.
    C_pad = _round_up(max(C, 128), 128)
    w_fc_p = jnp.pad(params["w_fc"], ((0, 0), (0, C_pad - C))).astype(compute_dtype)
    b_fc_p = jnp.pad(params["b_fc"], ((0, 0), (0, C_pad - C)), constant_values=-1e30)

    layer_args, layer_specs = [], []
    for i in range(num_layers):
        w = params[f"w{i + 1}"].astype(compute_dtype)     # pre-cast on host (halves DMA in bf16)
        b = params[f"b{i + 1}"]                           # bias stays f32
        layer_args += [w, b]
        layer_specs += [
            pl.BlockSpec(w.shape, lambda bi: (0, 0)),     # constant block index: fetched once
            pl.BlockSpec(b.shape, lambda bi: (0, 0)),
        ]

    # w_fc is the dominant VMEM consumer and its block index is constant -> single-buffer.
    try:
        wfc_spec = pl.BlockSpec((D, C_pad), lambda bi: (0, 0),
                                pipeline_mode=pl.Buffered(1))
    except Exception:  # older JAX without per-BlockSpec buffering: fall back silently
        wfc_spec = pl.BlockSpec((D, C_pad), lambda bi: (0, 0))

    # Advisory cost estimate for XLA's scheduler.
    flops = 0
    f_in = Fin
    for i in range(num_layers):
        f_out = params[f"w{i + 1}"].shape[1]
        if f_in <= f_out:
            flops += 2 * B * (N * N * f_in + N * f_in * f_out)
        else:
            flops += 2 * B * (N * f_in * f_out + N * N * f_out)
        f_in = f_out
    flops += 2 * B * D * C_pad
    bytes_accessed = ((x.size + adj.size) * x.dtype.itemsize
                      + sum(a.size * a.dtype.itemsize for a in layer_args)
                      + w_fc_p.size * w_fc_p.dtype.itemsize
                      + b_fc_p.size * 4 + B * C_pad * 4)

    out_pad = pl.pallas_call(
        _make_fused_gcn_kernel(num_layers, compute_dtype),
        out_shape=jax.ShapeDtypeStruct((B, C_pad), jnp.float32),
        grid_spec=pltpu.PrefetchScalarGridSpec(
            num_scalar_prefetch=0,
            grid=(B // Bt,),
            in_specs=[
                pl.BlockSpec((Bt, N, Fin), lambda bi: (bi, 0, 0)),
                pl.BlockSpec((Bt, N, N), lambda bi: (bi, 0, 0)),
                *layer_specs,
                wfc_spec,
                pl.BlockSpec((1, C_pad), lambda bi: (0, 0)),
            ],
            out_specs=pl.BlockSpec((Bt, C_pad), lambda bi: (bi, 0)),
            scratch_shapes=[
                pltpu.VMEM((Bt, N, H4), compute_dtype),   # layer-4 activation staging
                pltpu.VMEM((Bt, D), compute_dtype),       # flattened (Bt, N*H4) FC operand
            ],
        ),
        compiler_params=pltpu.CompilerParams(
            dimension_semantics=("parallel",),
            vmem_limit_bytes=_vmem_limit_bytes(),
        ),
        cost_estimate=pl.CostEstimate(
            flops=int(flops),
            transcendentals=int(B * C_pad),
            bytes_accessed=int(bytes_accessed),
        ),
    )(x, adj, *layer_args, w_fc_p, b_fc_p)
    return out_pad[:, :C]


# ----------------------------------------------------------------------------
# Pure-JAX reference (matches the PyTorch forward: adj @ (x @ w) + b, ReLU, FC, softmax)
# ----------------------------------------------------------------------------
def gcn_forward_ref(x, adj, params):
    h = x
    for i in (1, 2, 3, 4):
        support = jnp.einsum("bnf,fo->bno", h, params[f"w{i}"])
        h = jnp.einsum("bnm,bmo->bno", adj, support) + params[f"b{i}"]
        h = jnp.maximum(h, 0.0)
    h_flat = h.reshape(h.shape[0], -1)
    logits = h_flat @ params["w_fc"] + params["b_fc"]
    return jax.nn.softmax(logits, axis=1)


# ----------------------------------------------------------------------------
# Deterministic parameter init (mimics GraphConvolution.reset_parameters)
# ----------------------------------------------------------------------------
def init_params(key, maxAtomNum, featureNum, h1, h2, h3, h4, classNum):
    params = {}
    dims = [(featureNum, h1), (h1, h2), (h2, h3), (h3, h4)]
    keys = jax.random.split(key, 2 * len(dims) + 2)
    for i, (fin, fout) in enumerate(dims):
        stdv = 1.0 / math.sqrt(fout)
        params[f"w{i + 1}"] = jax.random.uniform(
            keys[2 * i], (fin, fout), jnp.float32, -stdv, stdv)
        params[f"b{i + 1}"] = jax.random.uniform(
            keys[2 * i + 1], (1, fout), jnp.float32, -stdv, stdv)
    fc_in = h4 * maxAtomNum
    stdv = 1.0 / math.sqrt(fc_in)
    params["w_fc"] = jax.random.uniform(
        keys[-2], (fc_in, classNum), jnp.float32, -stdv, stdv)
    params["b_fc"] = jax.random.uniform(
        keys[-1], (1, classNum), jnp.float32, -stdv, stdv)
    return params


if __name__ == "__main__":
    # Small shapes consistent with the module (real model: maxAtomNum=132, h4=256).
    # B=16 exercises the batch-tiled grid (Bt=8 -> 2 even "parallel" grid steps).
    B, N, F = 16, 16, 8          # batch, maxAtomNum, featureNum
    H1 = H2 = H3 = H4 = 32
    C = 4                        # classNum

    key = jax.random.PRNGKey(0)
    kx, kadj, kp = jax.random.split(key, 3)

    x = jax.random.normal(kx, (B, N, F), jnp.float32)
    # Symmetric, self-looped, row-normalized adjacency (typical GCN input).
    a = jax.random.uniform(kadj, (B, N, N), jnp.float32)
    a = (a + jnp.transpose(a, (0, 2, 1))) * 0.5 + jnp.eye(N)[None]
    adj = a / jnp.sum(a, axis=-1, keepdims=True)

    params = init_params(kp, N, F, H1, H2, H3, H4, C)
    ref = gcn_forward_ref(x, adj, params)

    # f32 path (default)
    out = jax.block_until_ready(gcn_forward(x, adj, params))
    assert out.shape == (B, C)
    assert jnp.allclose(jnp.sum(out, axis=1), 1.0, atol=1e-4)
    assert jnp.allclose(out, ref, atol=1e-4, rtol=1e-4)

    # bf16 MXU-operand path (f32 accumulation) - loose-tolerance validation.
    out_bf16 = jax.block_until_ready(
        gcn_forward(x, adj, params, compute_dtype=jnp.bfloat16))
    assert jnp.allclose(jnp.sum(out_bf16, axis=1), 1.0, atol=1e-3)
    assert jnp.allclose(out_bf16, ref, atol=2e-2)

    # Exact node padding (real model would pad/cap 132 toward 128-friendly sizes).
    x_p, adj_p, params_p = pad_graph_nodes(x, adj, params, 32)
    out_p = jax.block_until_ready(gcn_forward(x_p, adj_p, params_p))
    assert jnp.allclose(out_p, ref, atol=1e-4, rtol=1e-4)

    print("KERNEL_OK")
</pallas_src>

<mosaic_0001>
module attributes {stable_mosaic.version = 11 : i64} {
  func.func @kernel(%arg0: i32, %arg1: memref<8x16x8xf32, #tpu.memory_space<vmem>>, %arg2: memref<8x16x16xf32, #tpu.memory_space<vmem>>, %arg3: memref<8x32xf32, #tpu.memory_space<vmem>>, %arg4: memref<1x32xf32, #tpu.memory_space<vmem>>, %arg5: memref<32x32xf32, #tpu.memory_space<vmem>>, %arg6: memref<1x32xf32, #tpu.memory_space<vmem>>, %arg7: memref<32x32xf32, #tpu.memory_space<vmem>>, %arg8: memref<1x32xf32, #tpu.memory_space<vmem>>, %arg9: memref<32x32xf32, #tpu.memory_space<vmem>>, %arg10: memref<1x32xf32, #tpu.memory_space<vmem>>, %arg11: memref<512x128xf32, #tpu.memory_space<vmem>>, %arg12: memref<1x128xf32, #tpu.memory_space<vmem>>, %arg13: memref<8x128xf32, #tpu.memory_space<vmem>>, %arg14: memref<8x16x32xf32, #tpu.memory_space<vmem>>, %arg15: memref<8x512xf32, #tpu.memory_space<vmem>>) attributes {dimension_semantics = [#tpu.dimension_semantics<parallel>], iteration_bounds = array<i64: 2>, scalar_prefetch = 0 : i64, scratch_operands = 2 : i64, tpu.core_type = #tpu.core_type<tc>, window_params = [{transform_indices = @transform_0, window_bounds = array<i64: 8, 16, 8>}, {transform_indices = @transform_1, window_bounds = array<i64: 8, 16, 16>}, {pipeline_mode = #tpu.pipeline_mode<synchronous>, transform_indices = @transform_2, window_bounds = array<i64: 8, 32>}, {pipeline_mode = #tpu.pipeline_mode<synchronous>, transform_indices = @transform_3, window_bounds = array<i64: 1, 32>}, {pipeline_mode = #tpu.pipeline_mode<synchronous>, transform_indices = @transform_4, window_bounds = array<i64: 32, 32>}, {pipeline_mode = #tpu.pipeline_mode<synchronous>, transform_indices = @transform_5, window_bounds = array<i64: 1, 32>}, {pipeline_mode = #tpu.pipeline_mode<synchronous>, transform_indices = @transform_6, window_bounds = array<i64: 32, 32>}, {pipeline_mode = #tpu.pipeline_mode<synchronous>, transform_indices = @transform_7, window_bounds = array<i64: 1, 32>}, {pipeline_mode = #tpu.pipeline_mode<synchronous>, transform_indices = @transform_8, window_bounds = array<i64: 32, 32>}, {pipeline_mode = #tpu.pipeline_mode<synchronous>, transform_indices = @transform_9, window_bounds = array<i64: 1, 32>}, {pipeline_mode = #tpu.pipeline_mode<synchronous>, transform_indices = @transform_10, window_bounds = array<i64: 512, 128>}, {pipeline_mode = #tpu.pipeline_mode<synchronous>, transform_indices = @transform_11, window_bounds = array<i64: 1, 128>}, {transform_indices = @transform_12, window_bounds = array<i64: 8, 128>}]} {
    %c0 = arith.constant 0 : index
    %c0_0 = arith.constant 0 : index
    %c0_1 = arith.constant 0 : index
    %0 = vector.load %arg2[%c0, %c0_0, %c0_1] : memref<8x16x16xf32, #tpu.memory_space<vmem>>, vector<8x16x16xf32>
    %c0_2 = arith.constant 0 : index
    %c0_3 = arith.constant 0 : index
    %c0_4 = arith.constant 0 : index
    %1 = vector.load %arg1[%c0_2, %c0_3, %c0_4] : memref<8x16x8xf32, #tpu.memory_space<vmem>>, vector<8x16x8xf32>
    %c0_5 = arith.constant 0 : index
    %c0_6 = arith.constant 0 : index
    %2 = vector.load %arg3[%c0_5, %c0_6] : memref<8x32xf32, #tpu.memory_space<vmem>>, vector<8x32xf32>
    %c0_7 = arith.constant 0 : index
    %c0_8 = arith.constant 0 : index
    %3 = vector.load %arg4[%c0_7, %c0_8] : memref<1x32xf32, #tpu.memory_space<vmem>>, vector<1x32xf32>
    "tpu.trace_start"() <{level = 10 : i32, message = "bnm,bmf->bnf"}> : () -> ()
    %cst = arith.constant dense<0.000000e+00> : vector<8x16x8xf32>
    %4 = tpu.matmul %0, %1, %cst {dimension_numbers = #tpu.dot_dimension_numbers<[2], [1], [1], [2], [0, 0, 0, 1, 1, 2], [0], [0]>} : vector<8x16x16xf32>, vector<8x16x8xf32>, vector<8x16x8xf32> -> vector<8x16x8xf32>
    "tpu.trace_stop"() : () -> ()
    %5 = vector.shape_cast %4 : vector<8x16x8xf32> to vector<128x8xf32>
    %cst_9 = arith.constant dense<0.000000e+00> : vector<128x32xf32>
    %6 = tpu.matmul %5, %2, %cst_9 {dimension_numbers = #tpu.dot_dimension_numbers<[1], [0], [0], [1], [0, 0, 1, 1], [], []>} : vector<128x8xf32>, vector<8x32xf32>, vector<128x32xf32> -> vector<128x32xf32>
    %7 = vector.shape_cast %6 : vector<128x32xf32> to vector<8x16x32xf32>
    %8 = vector.shape_cast %3 : vector<1x32xf32> to vector<1x1x32xf32>
    %9 = vector.broadcast %8 : vector<1x1x32xf32> to vector<8x16x32xf32>
    %10 = arith.addf %7, %9 : vector<8x16x32xf32>
    %cst_10 = arith.constant 0.000000e+00 : f32
    %11 = vector.broadcast %cst_10 : f32 to vector<8x16x32xf32>
    %12 = arith.maximumf %10, %11 : vector<8x16x32xf32>
    %c0_11 = arith.constant 0 : index
    %c0_12 = arith.constant 0 : index
    %13 = vector.load %arg5[%c0_11, %c0_12] : memref<32x32xf32, #tpu.memory_space<vmem>>, vector<32x32xf32>
    %c0_13 = arith.constant 0 : index
    %c0_14 = arith.constant 0 : index
    %14 = vector.load %arg6[%c0_13, %c0_14] : memref<1x32xf32, #tpu.memory_space<vmem>>, vector<1x32xf32>
    "tpu.trace_start"() <{level = 10 : i32, message = "bnm,bmf->bnf"}> : () -> ()
    %cst_15 = arith.constant dense<0.000000e+00> : vector<8x16x32xf32>
    %15 = tpu.matmul %0, %12, %cst_15 {dimension_numbers = #tpu.dot_dimension_numbers<[2], [1], [1], [2], [0, 0, 0, 1, 1, 2], [0], [0]>} : vector<8x16x16xf32>, vector<8x16x32xf32>, vector<8x16x32xf32> -> vector<8x16x32xf32>
    "tpu.trace_stop"() : () -> ()
    %16 = vector.shape_cast %15 : vector<8x16x32xf32> to vector<128x32xf32>
    %cst_16 = arith.constant dense<0.000000e+00> : vector<128x32xf32>
    %17 = tpu.matmul %16, %13, %cst_16 {dimension_numbers = #tpu.dot_dimension_numbers<[1], [0], [0], [1], [0, 0, 1, 1], [], []>} : vector<128x32xf32>, vector<32x32xf32>, vector<128x32xf32> -> vector<128x32xf32>
    %18 = vector.shape_cast %17 : vector<128x32xf32> to vector<8x16x32xf32>
    %19 = vector.shape_cast %14 : vector<1x32xf32> to vector<1x1x32xf32>
    %20 = vector.broadcast %19 : vector<1x1x32xf32> to vector<8x16x32xf32>
    %21 = arith.addf %18, %20 : vector<8x16x32xf32>
    %cst_17 = arith.constant 0.000000e+00 : f32
    %22 = vector.broadcast %cst_17 : f32 to vector<8x16x32xf32>
    %23 = arith.maximumf %21, %22 : vector<8x16x32xf32>
    %c0_18 = arith.constant 0 : index
    %c0_19 = arith.constant 0 : index
    %24 = vector.load %arg7[%c0_18, %c0_19] : memref<32x32xf32, #tpu.memory_space<vmem>>, vector<32x32xf32>
    %c0_20 = arith.constant 0 : index
    %c0_21 = arith.constant 0 : index
    %25 = vector.load %arg8[%c0_20, %c0_21] : memref<1x32xf32, #tpu.memory_space<vmem>>, vector<1x32xf32>
    "tpu.trace_start"() <{level = 10 : i32, message = "bnm,bmf->bnf"}> : () -> ()
    %cst_22 = arith.constant dense<0.000000e+00> : vector<8x16x32xf32>
    %26 = tpu.matmul %0, %23, %cst_22 {dimension_numbers = #tpu.dot_dimension_numbers<[2], [1], [1], [2], [0, 0, 0, 1, 1, 2], [0], [0]>} : vector<8x16x16xf32>, vector<8x16x32xf32>, vector<8x16x32xf32> -> vector<8x16x32xf32>
    "tpu.trace_stop"() : () -> ()
    %27 = vector.shape_cast %26 : vector<8x16x32xf32> to vector<128x32xf32>
    %cst_23 = arith.constant dense<0.000000e+00> : vector<128x32xf32>
    %28 = tpu.matmul %27, %24, %cst_23 {dimension_numbers = #tpu.dot_dimension_numbers<[1], [0], [0], [1], [0, 0, 1, 1], [], []>} : vector<128x32xf32>, vector<32x32xf32>, vector<128x32xf32> -> vector<128x32xf32>
    %29 = vector.shape_cast %28 : vector<128x32xf32> to vector<8x16x32xf32>
    %30 = vector.shape_cast %25 : vector<1x32xf32> to vector<1x1x32xf32>
    %31 = vector.broadcast %30 : vector<1x1x32xf32> to vector<8x16x32xf32>
    %32 = arith.addf %29, %31 : vector<8x16x32xf32>
    %cst_24 = arith.constant 0.000000e+00 : f32
    %33 = vector.broadcast %cst_24 : f32 to vector<8x16x32xf32>
    %34 = arith.maximumf %32, %33 : vector<8x16x32xf32>
    %c0_25 = arith.constant 0 : index
    %c0_26 = arith.constant 0 : index
    %35 = vector.load %arg9[%c0_25, %c0_26] : memref<32x32xf32, #tpu.memory_space<vmem>>, vector<32x32xf32>
    %c0_27 = arith.constant 0 : index
    %c0_28 = arith.constant 0 : index
    %36 = vector.load %arg10[%c0_27, %c0_28] : memref<1x32xf32, #tpu.memory_space<vmem>>, vector<1x32xf32>
    "tpu.trace_start"() <{level = 10 : i32, message = "bnm,bmf->bnf"}> : () -> ()
    %cst_29 = arith.constant dense<0.000000e+00> : vector<8x16x32xf32>
    %37 = tpu.matmul %0, %34, %cst_29 {dimension_numbers = #tpu.dot_dimension_numbers<[2], [1], [1], [2], [0, 0, 0, 1, 1, 2], [0], [0]>} : vector<8x16x16xf32>, vector<8x16x32xf32>, vector<8x16x32xf32> -> vector<8x16x32xf32>
    "tpu.trace_stop"() : () -> ()
    %38 = vector.shape_cast %37 : vector<8x16x32xf32> to vector<128x32xf32>
    %cst_30 = arith.constant dense<0.000000e+00> : vector<128x32xf32>
    %39 = tpu.matmul %38, %35, %cst_30 {dimension_numbers = #tpu.dot_dimension_numbers<[1], [0], [0], [1], [0, 0, 1, 1], [], []>} : vector<128x32xf32>, vector<32x32xf32>, vector<128x32xf32> -> vector<128x32xf32>
    %40 = vector.shape_cast %39 : vector<128x32xf32> to vector<8x16x32xf32>
    %41 = vector.shape_cast %36 : vector<1x32xf32> to vector<1x1x32xf32>
    %42 = vector.broadcast %41 : vector<1x1x32xf32> to vector<8x16x32xf32>
    %43 = arith.addf %40, %42 : vector<8x16x32xf32>
    %cst_31 = arith.constant 0.000000e+00 : f32
    %44 = vector.broadcast %cst_31 : f32 to vector<8x16x32xf32>
    %45 = arith.maximumf %43, %44 : vector<8x16x32xf32>
    %c0_32 = arith.constant 0 : index
    %c0_33 = arith.constant 0 : index
    %c0_34 = arith.constant 0 : index
    %46 = vector.load %arg14[%c0_32, %c0_33, %c0_34] : memref<8x16x32xf32, #tpu.memory_space<vmem>>, vector<8x16x32xf32>
    tpu.vector_store %arg14[%c0_32, %c0_33, %c0_34], %45 {strides = array<i32>} : memref<8x16x32xf32, #tpu.memory_space<vmem>>, vector<8x16x32xf32>,
    %c0_35 = arith.constant 0 : index
    %c0_36 = arith.constant 0 : index
    %c0_37 = arith.constant 0 : index
    %47 = vector.load %arg14[%c0_35, %c0_36, %c0_37] : memref<8x16x32xf32, #tpu.memory_space<vmem>>, vector<8x1x32xf32>
    %48 = vector.shape_cast %47 : vector<8x1x32xf32> to vector<8x32xf32>
    %c0_38 = arith.constant 0 : index
    %c0_39 = arith.constant 0 : index
    %49 = vector.load %arg15[%c0_38, %c0_39] : memref<8x512xf32, #tpu.memory_space<vmem>>, vector<8x32xf32>
    tpu.vector_store %arg15[%c0_38, %c0_39], %48 {strides = array<i32>} : memref<8x512xf32, #tpu.memory_space<vmem>>, vector<8x32xf32>,
    %c0_40 = arith.constant 0 : index
    %c1 = arith.constant 1 : index
    %c0_41 = arith.constant 0 : index
    %50 = vector.load %arg14[%c0_40, %c1, %c0_41] : memref<8x16x32xf32, #tpu.memory_space<vmem>>, vector<8x1x32xf32>
    %51 = vector.shape_cast %50 : vector<8x1x32xf32> to vector<8x32xf32>
    %c0_42 = arith.constant 0 : index
    %c32 = arith.constant 32 : index
    %52 = vector.load %arg15[%c0_42, %c32] : memref<8x512xf32, #tpu.memory_space<vmem>>, vector<8x32xf32>
    tpu.vector_store %arg15[%c0_42, %c32], %51 {strides = array<i32>} : memref<8x512xf32, #tpu.memory_space<vmem>>, vector<8x32xf32>,
    %c0_43 = arith.constant 0 : index
    %c2 = arith.constant 2 : index
    %c0_44 = arith.constant 0 : index
    %53 = vector.load %arg14[%c0_43, %c2, %c0_44] : memref<8x16x32xf32, #tpu.memory_space<vmem>>, vector<8x1x32xf32>
    %54 = vector.shape_cast %53 : vector<8x1x32xf32> to vector<8x32xf32>
    %c0_45 = arith.constant 0 : index
    %c64 = arith.constant 64 : index
    %55 = vector.load %arg15[%c0_45, %c64] : memref<8x512xf32, #tpu.memory_space<vmem>>, vector<8x32xf32>
    tpu.vector_store %arg15[%c0_45, %c64], %54 {strides = array<i32>} : memref<8x512xf32, #tpu.memory_space<vmem>>, vector<8x32xf32>,
    %c0_46 = arith.constant 0 : index
    %c3 = arith.constant 3 : index
    %c0_47 = arith.constant 0 : index
    %56 = vector.load %arg14[%c0_46, %c3, %c0_47] : memref<8x16x32xf32, #tpu.memory_space<vmem>>, vector<8x1x32xf32>
    %57 = vector.shape_cast %56 : vector<8x1x32xf32> to vector<8x32xf32>
    %c0_48 = arith.constant 0 : index
    %c96 = arith.constant 96 : index
    %58 = vector.load %arg15[%c0_48, %c96] : memref<8x512xf32, #tpu.memory_space<vmem>>, vector<8x32xf32>
    tpu.vector_store %arg15[%c0_48, %c96], %57 {strides = array<i32>} : memref<8x512xf32, #tpu.memory_space<vmem>>, vector<8x32xf32>,
    %c0_49 = arith.constant 0 : index
    %c4 = arith.constant 4 : index
    %c0_50 = arith.constant 0 : index
    %59 = vector.load %arg14[%c0_49, %c4, %c0_50] : memref<8x16x32xf32, #tpu.memory_space<vmem>>, vector<8x1x32xf32>
    %60 = vector.shape_cast %59 : vector<8x1x32xf32> to vector<8x32xf32>
    %c0_51 = arith.constant 0 : index
    %c128 = arith.constant 128 : index
    %61 = vector.load %arg15[%c0_51, %c128] : memref<8x512xf32, #tpu.memory_space<vmem>>, vector<8x32xf32>
    tpu.vector_store %arg15[%c0_51, %c128], %60 {strides = array<i32>} : memref<8x512xf32, #tpu.memory_space<vmem>>, vector<8x32xf32>,
    %c0_52 = arith.constant 0 : index
    %c5 = arith.constant 5 : index
    %c0_53 = arith.constant 0 : index
    %62 = vector.load %arg14[%c0_52, %c5, %c0_53] : memref<8x16x32xf32, #tpu.memory_space<vmem>>, vector<8x1x32xf32>
    %63 = vector.shape_cast %62 : vector<8x1x32xf32> to vector<8x32xf32>
    %c0_54 = arith.constant 0 : index
    %c160 = arith.constant 160 : index
    %64 = vector.load %arg15[%c0_54, %c160] : memref<8x512xf32, #tpu.memory_space<vmem>>, vector<8x32xf32>
    tpu.vector_store %arg15[%c0_54, %c160], %63 {strides = array<i32>} : memref<8x512xf32, #tpu.memory_space<vmem>>, vector<8x32xf32>,
    %c0_55 = arith.constant 0 : index
    %c6 = arith.constant 6 : index
    %c0_56 = arith.constant 0 : index
    %65 = vector.load %arg14[%c0_55, %c6, %c0_56] : memref<8x16x32xf32, #tpu.memory_space<vmem>>, vector<8x1x32xf32>
    %66 = vector.shape_cast %65 : vector<8x1x32xf32> to vector<8x32xf32>
    %c0_57 = arith.constant 0 : index
    %c192 = arith.constant 192 : index
    %67 = vector.load %arg15[%c0_57, %c192] : memref<8x512xf32, #tpu.memory_space<vmem>>, vector<8x32xf32>
    tpu.vector_store %arg15[%c0_57, %c192], %66 {strides = array<i32>} : memref<8x512xf32, #tpu.memory_space<vmem>>, vector<8x32xf32>,
    %c0_58 = arith.constant 0 : index
    %c7 = arith.constant 7 : index
    %c0_59 = arith.constant 0 : index
    %68 = vector.load %arg14[%c0_58, %c7, %c0_59] : memref<8x16x32xf32, #tpu.memory_space<vmem>>, vector<8x1x32xf32>
    %69 = vector.shape_cast %68 : vector<8x1x32xf32> to vector<8x32xf32>
    %c0_60 = arith.constant 0 : index
    %c224 = arith.constant 224 : index
    %70 = vector.load %arg15[%c0_60, %c224] : memref<8x512xf32, #tpu.memory_space<vmem>>, vector<8x32xf32>
    tpu.vector_store %arg15[%c0_60, %c224], %69 {strides = array<i32>} : memref<8x512xf32, #tpu.memory_space<vmem>>, vector<8x32xf32>,
    %c0_61 = arith.constant 0 : index
    %c8 = arith.constant 8 : index
    %c0_62 = arith.constant 0 : index
    %71 = vector.load %arg14[%c0_61, %c8, %c0_62] : memref<8x16x32xf32, #tpu.memory_space<vmem>>, vector<8x1x32xf32>
    %72 = vector.shape_cast %71 : vector<8x1x32xf32> to vector<8x32xf32>
    %c0_63 = arith.constant 0 : index
    %c256 = arith.constant 256 : index
    %73 = vector.load %arg15[%c0_63, %c256] : memref<8x512xf32, #tpu.memory_space<vmem>>, vector<8x32xf32>
    tpu.vector_store %arg15[%c0_63, %c256], %72 {strides = array<i32>} : memref<8x512xf32, #tpu.memory_space<vmem>>, vector<8x32xf32>,
    %c0_64 = arith.constant 0 : index
    %c9 = arith.constant 9 : index
    %c0_65 = arith.constant 0 : index
    %74 = vector.load %arg14[%c0_64, %c9, %c0_65] : memref<8x16x32xf32, #tpu.memory_space<vmem>>, vector<8x1x32xf32>
    %75 = vector.shape_cast %74 : vector<8x1x32xf32> to vector<8x32xf32>
    %c0_66 = arith.constant 0 : index
    %c288 = arith.constant 288 : index
    %76 = vector.load %arg15[%c0_66, %c288] : memref<8x512xf32, #tpu.memory_space<vmem>>, vector<8x32xf32>
    tpu.vector_store %arg15[%c0_66, %c288], %75 {strides = array<i32>} : memref<8x512xf32, #tpu.memory_space<vmem>>, vector<8x32xf32>,
    %c0_67 = arith.constant 0 : index
    %c10 = arith.constant 10 : index
    %c0_68 = arith.constant 0 : index
    %77 = vector.load %arg14[%c0_67, %c10, %c0_68] : memref<8x16x32xf32, #tpu.memory_space<vmem>>, vector<8x1x32xf32>
    %78 = vector.shape_cast %77 : vector<8x1x32xf32> to vector<8x32xf32>
    %c0_69 = arith.constant 0 : index
    %c320 = arith.constant 320 : index
    %79 = vector.load %arg15[%c0_69, %c320] : memref<8x512xf32, #tpu.memory_space<vmem>>, vector<8x32xf32>
    tpu.vector_store %arg15[%c0_69, %c320], %78 {strides = array<i32>} : memref<8x512xf32, #tpu.memory_space<vmem>>, vector<8x32xf32>,
    %c0_70 = arith.constant 0 : index
    %c11 = arith.constant 11 : index
    %c0_71 = arith.constant 0 : index
    %80 = vector.load %arg14[%c0_70, %c11, %c0_71] : memref<8x16x32xf32, #tpu.memory_space<vmem>>, vector<8x1x32xf32>
    %81 = vector.shape_cast %80 : vector<8x1x32xf32> to vector<8x32xf32>
    %c0_72 = arith.constant 0 : index
    %c352 = arith.constant 352 : index
    %82 = vector.load %arg15[%c0_72, %c352] : memref<8x512xf32, #tpu.memory_space<vmem>>, vector<8x32xf32>
    tpu.vector_store %arg15[%c0_72, %c352], %81 {strides = array<i32>} : memref<8x512xf32, #tpu.memory_space<vmem>>, vector<8x32xf32>,
    %c0_73 = arith.constant 0 : index
    %c12 = arith.constant 12 : index
    %c0_74 = arith.constant 0 : index
    %83 = vector.load %arg14[%c0_73, %c12, %c0_74] : memref<8x16x32xf32, #tpu.memory_space<vmem>>, vector<8x1x32xf32>
    %84 = vector.shape_cast %83 : vector<8x1x32xf32> to vector<8x32xf32>
    %c0_75 = arith.constant 0 : index
    %c384 = arith.constant 384 : index
    %85 = vector.load %arg15[%c0_75, %c384] : memref<8x512xf32, #tpu.memory_space<vmem>>, vector<8x32xf32>
    tpu.vector_store %arg15[%c0_75, %c384], %84 {strides = array<i32>} : memref<8x512xf32, #tpu.memory_space<vmem>>, vector<8x32xf32>,
    %c0_76 = arith.constant 0 : index
    %c13 = arith.constant 13 : index
    %c0_77 = arith.constant 0 : index
    %86 = vector.load %arg14[%c0_76, %c13, %c0_77] : memref<8x16x32xf32, #tpu.memory_space<vmem>>, vector<8x1x32xf32>
    %87 = vector.shape_cast %86 : vector<8x1x32xf32> to vector<8x32xf32>
    %c0_78 = arith.constant 0 : index
    %c416 = arith.constant 416 : index
    %88 = vector.load %arg15[%c0_78, %c416] : memref<8x512xf32, #tpu.memory_space<vmem>>, vector<8x32xf32>
    tpu.vector_store %arg15[%c0_78, %c416], %87 {strides = array<i32>} : memref<8x512xf32, #tpu.memory_space<vmem>>, vector<8x32xf32>,
    %c0_79 = arith.constant 0 : index
    %c14 = arith.constant 14 : index
    %c0_80 = arith.constant 0 : index
    %89 = vector.load %arg14[%c0_79, %c14, %c0_80] : memref<8x16x32xf32, #tpu.memory_space<vmem>>, vector<8x1x32xf32>
    %90 = vector.shape_cast %89 : vector<8x1x32xf32> to vector<8x32xf32>
    %c0_81 = arith.constant 0 : index
    %c448 = arith.constant 448 : index
    %91 = vector.load %arg15[%c0_81, %c448] : memref<8x512xf32, #tpu.memory_space<vmem>>, vector<8x32xf32>
    tpu.vector_store %arg15[%c0_81, %c448], %90 {strides = array<i32>} : memref<8x512xf32, #tpu.memory_space<vmem>>, vector<8x32xf32>,
    %c0_82 = arith.constant 0 : index
    %c15 = arith.constant 15 : index
    %c0_83 = arith.constant 0 : index
    %92 = vector.load %arg14[%c0_82, %c15, %c0_83] : memref<8x16x32xf32, #tpu.memory_space<vmem>>, vector<8x1x32xf32>
    %93 = vector.shape_cast %92 : vector<8x1x32xf32> to vector<8x32xf32>
    %c0_84 = arith.constant 0 : index
    %c480 = arith.constant 480 : index
    %94 = vector.load %arg15[%c0_84, %c480] : memref<8x512xf32, #tpu.memory_space<vmem>>, vector<8x32xf32>
    tpu.vector_store %arg15[%c0_84, %c480], %93 {strides = array<i32>} : memref<8x512xf32, #tpu.memory_space<vmem>>, vector<8x32xf32>,
    %c0_85 = arith.constant 0 : index
    %c0_86 = arith.constant 0 : index
    %95 = vector.load %arg15[%c0_85, %c0_86] : memref<8x512xf32, #tpu.memory_space<vmem>>, vector<8x512xf32>
    %c0_87 = arith.constant 0 : index
    %c0_88 = arith.constant 0 : index
    %96 = vector.load %arg11[%c0_87, %c0_88] : memref<512x128xf32, #tpu.memory_space<vmem>>, vector<512x128xf32>
    %cst_89 = arith.constant dense<0.000000e+00> : vector<8x128xf32>
    %97 = tpu.matmul %95, %96, %cst_89 {dimension_numbers = #tpu.dot_dimension_numbers<[1], [0], [0], [1], [0, 0, 1, 1], [], []>} : vector<8x512xf32>, vector<512x128xf32>, vector<8x128xf32> -> vector<8x128xf32>
    %c0_90 = arith.constant 0 : index
    %c0_91 = arith.constant 0 : index
    %98 = vector.load %arg12[%c0_90, %c0_91] : memref<1x128xf32, #tpu.memory_space<vmem>>, vector<1x128xf32>
    %99 = vector.broadcast %98 : vector<1x128xf32> to vector<8x128xf32>
    %100 = arith.addf %97, %99 : vector<8x128xf32>
    %cst_92 = arith.constant dense<0xFF800000> : vector<8xf32>
    %101 = vector.multi_reduction <maximumf>, %100, %cst_92 [1] : vector<8x128xf32> to vector<8xf32>
    %102 = vector.shape_cast %101 : vector<8xf32> to vector<8x1xf32>
    %103 = vector.broadcast %102 : vector<8x1xf32> to vector<8x128xf32>
    %104 = arith.subf %100, %103 : vector<8x128xf32>
    %105 = math.exp %104 : vector<8x128xf32>
    %cst_93 = arith.constant dense<0.000000e+00> : vector<8xf32>
    %106 = vector.multi_reduction <add>, %105, %cst_93 [1] : vector<8x128xf32> to vector<8xf32>
    %107 = vector.shape_cast %106 : vector<8xf32> to vector<8x1xf32>
    %108 = tpu.reciprocal %107 {approx = true} : vector<8x1xf32> -> vector<8x1xf32>
    %109 = arith.mulf %107, %108 : vector<8x1xf32>
    %cst_94 = arith.constant 2.000000e+00 : f32
    %110 = vector.broadcast %cst_94 : f32 to vector<8x1xf32>
    %111 = arith.subf %110, %109 : vector<8x1xf32>
    %112 = arith.mulf %108, %111 : vector<8x1xf32>
    %113 = vector.broadcast %112 : vector<8x1xf32> to vector<8x128xf32>
    %114 = arith.mulf %105, %113 : vector<8x128xf32>
    %c0_95 = arith.constant 0 : index
    %c0_96 = arith.constant 0 : index
    %115 = vector.load %arg13[%c0_95, %c0_96] : memref<8x128xf32, #tpu.memory_space<vmem>>, vector<8x128xf32>
    tpu.vector_store %arg13[%c0_95, %c0_96], %114 {strides = array<i32>} : memref<8x128xf32, #tpu.memory_space<vmem>>, vector<8x128xf32>,
    return
  }
  func.func @transform_0(%arg0: i32) -> (i32, i32, i32) {
    %c0_i32 = arith.constant 0 : i32
    %c0_i32_0 = arith.constant 0 : i32
    %c0_i32_1 = arith.constant 0 : i32
    return %arg0, %c0_i32, %c0_i32_0 : i32, i32, i32
  }
  func.func @transform_1(%arg0: i32) -> (i32, i32, i32) {
    %c0_i32 = arith.constant 0 : i32
    %c0_i32_0 = arith.constant 0 : i32
    %c0_i32_1 = arith.constant 0 : i32
    return %arg0, %c0_i32, %c0_i32_0 : i32, i32, i32
  }
  func.func @transform_2(%arg0: i32) -> (i32, i32) {
    %c0_i32 = arith.constant 0 : i32
    %c0_i32_0 = arith.constant 0 : i32
    %c0_i32_1 = arith.constant 0 : i32
    return %c0_i32, %c0_i32_0 : i32, i32
  }
  func.func @transform_3(%arg0: i32) -> (i32, i32) {
    %c0_i32 = arith.constant 0 : i32
    %c0_i32_0 = arith.constant 0 : i32
    %c0_i32_1 = arith.constant 0 : i32
    return %c0_i32, %c0_i32_0 : i32, i32
  }
  func.func @transform_4(%arg0: i32) -> (i32, i32) {
    %c0_i32 = arith.constant 0 : i32
    %c0_i32_0 = arith.constant 0 : i32
    %c0_i32_1 = arith.constant 0 : i32
    return %c0_i32, %c0_i32_0 : i32, i32
  }
  func.func @transform_5(%arg0: i32) -> (i32, i32) {
    %c0_i32 = arith.constant 0 : i32
    %c0_i32_0 = arith.constant 0 : i32
    %c0_i32_1 = arith.constant 0 : i32
    return %c0_i32, %c0_i32_0 : i32, i32
  }
  func.func @transform_6(%arg0: i32) -> (i32, i32) {
    %c0_i32 = arith.constant 0 : i32
    %c0_i32_0 = arith.constant 0 : i32
    %c0_i32_1 = arith.constant 0 : i32
    return %c0_i32, %c0_i32_0 : i32, i32
  }
  func.func @transform_7(%arg0: i32) -> (i32, i32) {
    %c0_i32 = arith.constant 0 : i32
    %c0_i32_0 = arith.constant 0 : i32
    %c0_i32_1 = arith.constant 0 : i32
    return %c0_i32, %c0_i32_0 : i32, i32
  }
  func.func @transform_8(%arg0: i32) -> (i32, i32) {
    %c0_i32 = arith.constant 0 : i32
    %c0_i32_0 = arith.constant 0 : i32
    %c0_i32_1 = arith.constant 0 : i32
    return %c0_i32, %c0_i32_0 : i32, i32
  }
  func.func @transform_9(%arg0: i32) -> (i32, i32) {
    %c0_i32 = arith.constant 0 : i32
    %c0_i32_0 = arith.constant 0 : i32
    %c0_i32_1 = arith.constant 0 : i32
    return %c0_i32, %c0_i32_0 : i32, i32
  }
  func.func @transform_10(%arg0: i32) -> (i32, i32) {
    %c0_i32 = arith.constant 0 : i32
    %c0_i32_0 = arith.constant 0 : i32
    %c0_i32_1 = arith.constant 0 : i32
    return %c0_i32, %c0_i32_0 : i32, i32
  }
  func.func @transform_11(%arg0: i32) -> (i32, i32) {
    %c0_i32 = arith.constant 0 : i32
    %c0_i32_0 = arith.constant 0 : i32
    %c0_i32_1 = arith.constant 0 : i32
    return %c0_i32, %c0_i32_0 : i32, i32
  }
  func.func @transform_12(%arg0: i32) -> (i32, i32) {
    %c0_i32 = arith.constant 0 : i32
    %c0_i32_0 = arith.constant 0 : i32
    return %arg0, %c0_i32 : i32, i32
  }
}

</mosaic_0001>

<bundles_post_ra>
// kernel: gcn_forward.1
= control target key start
LH: loop header
LB: loop body
LE: loop exit
PB: predicated region body
PF: predicated region fallthrough
CT: control target
= control target key end

     0   :  { %s5798_s21 = smov 0   ;;  %s6549_s0 = inlined_call_operand.vmem [shape: f32[16,16,8], index: 0, kind: input, shape index: {}]   ;;  %s6550_s1 = inlined_call_operand.vmem [shape: f32[16,16,16], index: 1, kind: input, shape index: {}]   ;;  %s6551_s2 = inlined_call_operand.vmem [shape: f32[8,32], index: 2, kind: input, shape index: {}]   ;;  %s6552_s3 = inlined_call_operand.vmem [shape: f32[1,32], index: 3, kind: input, shape index: {}]   ;;  %s6553_s4 = inlined_call_operand.vmem [shape: f32[32,32], index: 4, kind: input, shape index: {}]   ;;  %s6554_s5 = inlined_call_operand.vmem [shape: f32[1,32], index: 5, kind: input, shape index: {}]   ;;  %s6555_s6 = inlined_call_operand.vmem [shape: f32[32,32], index: 6, kind: input, shape index: {}]   ;;  %s6556_s7 = inlined_call_operand.vmem [shape: f32[1,32], index: 7, kind: input, shape index: {}]   ;;  %s6557_s8 = inlined_call_operand.vmem [shape: f32[32,32], index: 8, kind: input, shape index: {}]   ;;  %s6558_s9 = inlined_call_operand.vmem [shape: f32[1,32], index: 9, kind: input, shape index: {}]   ;;  %s6559_s10 = inlined_call_operand.vmem [shape: f32[512,128], index: 10, kind: input, shape index: {}]   ;;  %s6560_s11 = inlined_call_operand.vmem [shape: f32[1,128], index: 11, kind: input, shape index: {}]   ;;  %s6561_s12 = inlined_call_operand.vmem [shape: f32[16,128], index: 12, kind: output, shape index: {}]  }
   0x1 LB: > { %s5804_s22 = sadd.s32 4294967295, %s5728_s21   ;;  %p4725_p0 = scmp.ge.s32.totalorder %s5728_s21, 1  ;;  %s5728_s21 = sphi %s5798_s21, %s22_s21  }
   0x2   : > { %p376_p1 = scmp.lt.s32.totalorder %s5728_s21, 3 }
   0x4   : > { %p377_p2 = pnand %p4725_p0, %p376_p1 }
   0x5   : > { %s4726_s23 = sshll.u32 (!%p377_p2), %s5804_s22, 3  ;;  %vm476_vm0 = vcmask (!%p377_p2), 130048   ;;  %v474_v38 = vld [vmem:[%s6551_s2] sm:$0xff] (!%p377_p2)  ;;  %vm1125_vm1 = vcmask (!%p377_p2), 64512   ;;  %v1358_v58 = vld [vmem:[%s6553_s4 + $0x8] sm:$0xff] (!%p377_p2)  ;;  %v1359_v59 = vld [vmem:[%s6553_s4 + $0x10] sm:$0xff] (!%p377_p2) }
   0x6   : > { %380 = sbr.rel (%p377_p2) target bundleno = 2492 (0x9bc), region = 68  ;;  %p425_p3 = scmp.lt.s32.totalorder (!%p377_p2), %s4726_s23, 15  ;;  %v1357_v57 = vld [vmem:[%s6553_s4] sm:$0xff] (!%p377_p2)  ;;  %v1360_v61 = vld [vmem:[%s6553_s4 + $0x18] sm:$0xff] (!%p377_p2)  ;;  %vm1962_vm2 = vcmask (!%p377_p2), 261120   ;;  %vm3899_vm3 = vcmask (!%p377_p2), 1041409  }
   0x7   : > { %v5555_v60 = vpack.c.bf16 (!%p377_p2), %v1358_v58, %v1357_v57  ;;  %v5559_v62 = vpack.c.bf16 (!%p377_p2), %v1360_v61, %v1359_v59  ;;  %v5951_v63 = vld [vmem:[%s6552_s3] ss:$0 sm:$0xff] (!%p377_p2)  ;;  %vm3902_vm4 = vcmask (!%p377_p2), 1042434   ;;  %vm3905_vm5 = vcmask (!%p377_p2), 1043459   ;;  %s5730_s29 = smov (!%p377_p2), 64   ;;  %s5732_s13 = smov (!%p377_p2), 96  }
   0x8   : > { %vm3908_vm6 = vcmask (!%p377_p2), 1044484   ;;  %vm3911_vm7 = vcmask (!%p377_p2), 1045509   ;;  %vm3914_vm8 = vcmask (!%p377_p2), 1046534   ;;  %vm3917_vm9 = vcmask (!%p377_p2), 1047559   ;;  %p438_p4 = scmp.lt.s32.totalorder (!%p377_p2), %s5804_s22, 1 }
   0x9   : > { %vm3954_vm10 = vcmask (!%p377_p2), 523520   ;;  %vm3989_vm11 = vcmask (!%p377_p2), 785920   ;;  %vm4024_vm12 = vcmask (!%p377_p2), 1048320  }
   0xd   : > { %s6563_s23 = smov (!%p425_p3, %s4726_s23), 15  ;;  %s6565_s22 = smov (!%p438_p4, %s5804_s22), 1 }
   0xe   : > { %s4868_s24 = sshll.u32 %s6563_s23, 4  ;;  %s4732_s20 = sshll.u32 %s6565_s22, 3 }
   0xf   : > { %s5812_s27 = scalar_lea.vmem %s6549_s0, %s4868_s24  ;;  %s5817_s30 = scalar_lea.vmem %s6550_s1, %s4868_s24 }
  0x10   : > { %v458_v0 = vld [vmem:[%s5812_s27] sm:$0xff]  ;;  %v459_v1 = vld [vmem:[%s5812_s27 + $0x8] sm:$0xff]  ;;  %v460_v4 = vld [vmem:[%s5812_s27 + $0x10] sm:$0xff]  ;;  %s441_s25 = scalar_lea.vmem %s6561_s12, %s4732_s20 }
  0x11   : > { %v5822_v2 = vld [vmem:[%s5817_s30] sm:$0xff]  ;;  %v5491_v3 = vpack.c.bf16 %v459_v1, %v458_v0  ;;  %v461_v5 = vld [vmem:[%s5812_s27 + $0x18] sm:$0xff]  ;;  %v5829_v7 = vld [vmem:[%s5817_s30 + $0x10] sm:$0xff] }
  0x12   : > { %5149 = vmatprep.mubr.msk.f32.mxu0 %vm476_vm0, %v5822_v2  ;;  %v5495_v6 = vpack.c.bf16 %v461_v5, %v460_v4  ;;  %v462_v8 = vld [vmem:[%s5812_s27 + $0x20] sm:$0xff]  ;;  %5156 = vmatprep.mubr.msk.f32.mxu1 %vm476_vm0, %v5829_v7  ;;  %v463_v9 = vld [vmem:[%s5812_s27 + $0x28] sm:$0xff]  ;;  %v464_v12 = vld [vmem:[%s5812_s27 + $0x30] sm:$0xff] }
  0x13   : > { %5492 = vmatprep.subr.bf16.mxu0 %v5491_v3  ;;  %v5836_v10 = vld [vmem:[%s5817_s30 + $0x8] sm:$0xff]  ;;  %v5499_v11 = vpack.c.bf16 %v463_v9, %v462_v8  ;;  %v465_v13 = vld [vmem:[%s5812_s27 + $0x38] sm:$0xff]  ;;  %v466_v16 = vld [vmem:[%s5812_s27 + $0x40] sm:$0xff] }
  0x14   : > { %5494 = vmatpush3.bf16.msra.mxu0 %v5491_v3  ;;  %5496 = vmatprep.subr.bf16.mxu1 %v5495_v6  ;;  %v5841_v14 = vld [vmem:[%s5817_s30 + $0x18] sm:$0xff]  ;;  %v5503_v15 = vpack.c.bf16 %v465_v13, %v464_v12  ;;  %v467_v17 = vld [vmem:[%s5812_s27 + $0x48] sm:$0xff]  ;;  %v5846_v18 = vld [vmem:[%s5817_s30 + $0x20] sm:$0xff] }
  0x15   : > { %5498 = vmatpush3.bf16.msra.mxu1 %v5495_v6  ;;  %5500 = vmatprep.subr.bf16.mxu0 %v5499_v11  ;;  %v5507_v19 = vpack.c.bf16 %v467_v17, %v466_v16  ;;  %v468_v20 = vld [vmem:[%s5812_s27 + $0x50] sm:$0xff]  ;;  %v469_v22 = vld [vmem:[%s5812_s27 + $0x58] sm:$0xff]  ;;  %v5858_v23 = vld [vmem:[%s5817_s30 + $0x28] sm:$0xff] }
  0x16   : > { %5504 = vmatprep.subr.bf16.mxu1 %v5503_v15  ;;  %v5852_v21 = vld [vmem:[%s5817_s30 + $0x30] sm:$0xff]  ;;  %v5511_v24 = vpack.c.bf16 %v469_v22, %v468_v20  ;;  %v470_v25 = vld [vmem:[%s5812_s27 + $0x60] sm:$0xff]  ;;  %v471_v26 = vld [vmem:[%s5812_s27 + $0x68] sm:$0xff] }
  0x17   : > { %5150 = vmatmul.mubr.msk.f32.vlgmr.msra.gmra.mrb[0].mxu0 %vm476_vm0, %v5836_v10  ;;  %v5865_v27 = vld [vmem:[%s5817_s30 + $0x38] sm:$0xff]  ;;  %v472_v28 = vld [vmem:[%s5812_s27 + $0x70] sm:$0xff]  ;;  %v5872_v30 = vld [vmem:[%s5817_s30 + $0x40] sm:$0xff]  ;;  %v5515_v31 = vpack.c.bf16 %v471_v26, %v470_v25 }
  0x18   : > { %5157 = vmatmul.mubr.msk.f32.vlgmr.msra.gmra.mrb[0].mxu1 %vm476_vm0, %v5841_v14  ;;  %5502 = vmatpush3.bf16.msra.mxu0 %v5499_v11  ;;  %v473_v29 = vld [vmem:[%s5812_s27 + $0x78] sm:$0xff]  ;;  %v5877_v32 = vld [vmem:[%s5817_s30 + $0x50] sm:$0xff]  ;;  %v5882_v34 = vld [vmem:[%s5817_s30 + $0x48] sm:$0xff] }
  0x19   : > { %5163 = vmatprep.mubr.msk.f32.mxu0 %vm476_vm0, %v5846_v18  ;;  %5506 = vmatpush3.bf16.msra.mxu1 %v5503_v15  ;;  %v5519_v33 = vpack.c.bf16 %v473_v29, %v472_v28  ;;  %v5887_v35 = vld [vmem:[%s5817_s30 + $0x58] sm:$0xff]  ;;  %v5892_v36 = vld [vmem:[%s5817_s30 + $0x60] sm:$0xff]  ;;  %v5897_v37 = vld [vmem:[%s5817_s30 + $0x70] sm:$0xff] }
  0x1a   : > { %5170 = vmatprep.mubr.msk.f32.mxu1 %vm476_vm0, %v5852_v21  ;;  %5508 = vmatprep.subr.bf16.mxu0 %v5507_v19  ;;  %v5905_v39 = vld [vmem:[%s5817_s30 + $0x68] sm:$0xff]  ;;  %v5910_v40 = vld [vmem:[%s5817_s30 + $0x78] sm:$0xff]  ;;  %s5731_s30 = smov 32  }
  0x1b   : > { %5164 = vmatmul.mubr.msk.f32.vlgmr.msra.gmra.mrb[2].mxu0 %vm476_vm0, %v5858_v23  ;;  %5512 = vmatprep.subr.bf16.mxu1 %v5511_v24 }
  0x1c   : > { %5171 = vmatmul.mubr.msk.f32.vlgmr.msra.gmra.mrb[2].mxu1 %vm476_vm0, %v5865_v27  ;;  %5510 = vmatpush3.bf16.msra.mxu0 %v5507_v19 }
  0x1d   : > { %5177 = vmatprep.mubr.msk.f32.mxu0 %vm476_vm0, %v5872_v30  ;;  %5514 = vmatpush3.bf16.msra.mxu1 %v5511_v24 }
  0x1e   : > { %5184 = vmatprep.mubr.msk.f32.mxu1 %vm476_vm0, %v5877_v32  ;;  %5516 = vmatprep.subr.bf16.mxu0 %v5515_v31 }
  0x1f   : > { %5178 = vmatmul.mubr.msk.f32.vlgmr.msra.gmra.mrb[4].mxu0 %vm476_vm0, %v5882_v34  ;;  %5520 = vmatprep.subr.bf16.mxu1 %v5519_v33 }
  0x20   : > { %5185 = vmatmul.mubr.msk.f32.vlgmr.msra.gmra.mrb[4].mxu1 %vm476_vm0, %v5887_v35  ;;  %5518 = vmatpush3.bf16.msra.mxu0 %v5515_v31 }
  0x21   : > { %5191 = vmatprep.mubr.msk.f32.mxu0 %vm476_vm0, %v5892_v36  ;;  %5522 = vmatpush3.bf16.msra.mxu1 %v5519_v33 }
  0x22   : > { %5198 = vmatprep.mubr.msk.f32.mxu1 %vm476_vm0, %v5897_v37  ;;  %5201 = vmatprep.subr.mxu0 %v474_v38 }
  0x23   : > { %5192 = vmatmul.mubr.msk.f32.vlgmr.msra.gmra.mrb[6].mxu0 %vm476_vm0, %v5905_v39 }
  0x24   : > { %5199 = vmatmul.mubr.msk.f32.vlgmr.msra.gmra.mrb[6].mxu1 %vm476_vm0, %v5910_v40  ;;  %5202 = vmatpush3.msra.mxu0 %v474_v38 }
  0x25   : > { %5231 = vmatprep.mubr.msk.f32.mxu1 %vm476_vm0, %v5822_v2  ;;  %5556 = vmatprep.subr.bf16.mxu0 %v5555_v60 }
  0xea   : > { %v5151_v41 = vpop.f32.mrb[0].mxu0 }
  0xeb   : > { %v549_v42 = vpop.f32.mrb[1].mxu0  ;;  %v5158_v43 = vpop.f32.mrb[0].mxu1 }
  0xec   : > { %5203 = vmatprep.mubr.msk.f32.mxu0 %vm1125_vm1, %v549_v42  ;;  %v630_v44 = vpop.f32.mrb[1].mxu1 }
  0xed   : > { %5204 = vmatmul.mubr.msk.f32.vlgmr.msra.gmra.mrb[8].mxu0 %vm1125_vm1, %v5151_v41 }
  0xee   : > { %5206 = vmatprep.mubr.msk.f32.mxu0 %vm1125_vm1, %v630_v44  ;;  %v5165_v45 = vpop.f32.mrb[2].mxu0  ;;  %5558 = vmatpush3.bf16.msra.mxu0 %v5555_v60 }
  0xef   : > { %v711_v46 = vpop.f32.mrb[3].mxu0  ;;  %v5172_v47 = vpop.f32.mrb[2].mxu1  ;;  %5560 = vmatprep.subr.bf16.mxu0 %v5559_v62 }
  0xf0   : > { %v792_v48 = vpop.f32.mrb[3].mxu1 }
  0xf1   : > { %5207 = vmatmul.mubr.msk.f32.gmra.mrb[10].mxu0 %vm1125_vm1, %v5158_v43 }
  0xf2   : > { %5209 = vmatprep.mubr.msk.f32.mxu0 %vm1125_vm1, %v711_v46  ;;  %v5179_v49 = vpop.f32.mrb[4].mxu0  ;;  %5562 = vmatpush3.bf16.msra.mxu0 %v5559_v62 }
  0xf3   : > { %v873_v50 = vpop.f32.mrb[5].mxu0  ;;  %v5186_v51 = vpop.f32.mrb[4].mxu1 }
  0xf4   : > { %v954_v52 = vpop.f32.mrb[5].mxu1 }
  0xf5   : > { %5210 = vmatmul.mubr.msk.f32.gmra.mrb[12].mxu0 %vm1125_vm1, %v5165_v45 }
  0xf6   : > { %5212 = vmatprep.mubr.msk.f32.mxu0 %vm1125_vm1, %v792_v48  ;;  %v5193_v53 = vpop.f32.mrb[6].mxu0 }
  0xf7   : > { %v1035_v54 = vpop.f32.mrb[7].mxu0  ;;  %v5200_v55 = vpop.f32.mrb[6].mxu1 }
  0xf8   : > { %v1116_v56 = vpop.f32.mrb[7].mxu1 }
  0xf9   : > { %5213 = vmatmul.mubr.msk.f32.gmra.mrb[14].mxu0 %vm1125_vm1, %v5172_v47 }
  0xfa   : > { %5215 = vmatprep.mubr.msk.f32.mxu0 %vm1125_vm1, %v873_v50 }
  0xfd   : > { %5216 = vmatmul.mubr.msk.f32.gmra.mrb[16].mxu0 %vm1125_vm1, %v5179_v49 }
  0xfe   : > { %5218 = vmatprep.mubr.msk.f32.mxu0 %vm1125_vm1, %v954_v52 }
 0x101   : > { %5219 = vmatmul.mubr.msk.f32.gmra.mrb[18].mxu0 %vm1125_vm1, %v5186_v51 }
 0x102   : > { %5221 = vmatprep.mubr.msk.f32.mxu0 %vm1125_vm1, %v1035_v54 }
 0x105   : > { %5222 = vmatmul.mubr.msk.f32.gmra.mrb[20].mxu0 %vm1125_vm1, %v5193_v53 }
 0x106   : > { %5224 = vmatprep.mubr.msk.f32.mxu0 %vm1125_vm1, %v1116_v56 }
 0x109   : > { %5225 = vmatmul.mubr.msk.f32.gmra.mrb[22].mxu0 %vm1125_vm1, %v5200_v55 }
 0x1c0   : > { %v5205_v0 = vpop.f32.mrb[8].mxu0 }
 0x1c1   : > { %v1326_v1 = vadd.f32 %v5205_v0, %v5951_v63  ;;  %v1240_v3 = vpop.f32.mrb[9].mxu0 }
 0x1c2   : > { %v1325_v4 = vadd.f32 %v5951_v63, %v1240_v3 }
 0x1c3   : > { %v1342_v5 = vmax.f32 %v1326_v1, 0.0 }
 0x1c4   : > { %v1341_v6 = vmax.f32 %v1325_v4, 0.0  ;;  %v5208_v8 = vpop.f32.mrb[10].mxu0 }
 0x1c5   : > { %v1328_v9 = vadd.f32 %v5208_v8, %v5951_v63  ;;  %v1250_v11 = vpop.f32.mrb[11].mxu0 }
 0x1c6   : > { %v5523_v12 = vpack.c.bf16 %v1342_v5, %v1341_v6  ;;  %v1327_v13 = vadd.f32 %v5951_v63, %v1250_v11 }
 0x1c7   : > { %v1344_v15 = vmax.f32 %v1328_v9, 0.0 }
 0x1c8   : > { %v1343_v16 = vmax.f32 %v1327_v13, 0.0  ;;  %v5211_v17 = vpop.f32.mrb[12].mxu0  ;;  %5524 = vmatprep.subr.bf16.mxu1 %v5523_v12 }
 0x1c9   : > { %v1330_v19 = vadd.f32 %v5211_v17, %v5951_v63  ;;  %v1260_v20 = vpop.f32.mrb[13].mxu0  ;;  %5526 = vmatpush3.bf16.msra.mxu1 %v5523_v12 }
 0x1ca   : > { %v5527_v22 = vpack.c.bf16 %v1344_v15, %v1343_v16  ;;  %v1329_v24 = vadd.f32 %v5951_v63, %v1260_v20 }
 0x1cb   : > { %v1346_v25 = vmax.f32 %v1330_v19, 0.0 }
 0x1cc   : > { %v1345_v26 = vmax.f32 %v1329_v24, 0.0  ;;  %v5214_v28 = vpop.f32.mrb[14].mxu0  ;;  %5232 = vmatmul.mubr.msk.f32.vlgmr.msra.gmra.mrb[8].mxu1 %vm476_vm0, %v5836_v10  ;;  %5528 = vmatprep.subr.bf16.mxu1 %v5527_v22 }
 0x1cd   : > { %v1332_v29 = vadd.f32 %v5214_v28, %v5951_v63  ;;  %v1270_v31 = vpop.f32.mrb[15].mxu0  ;;  %5530 = vmatpush3.bf16.msra.mxu1 %v5527_v22  ;;  %5238 = vmatprep.mubr.msk.f32.mxu1 %vm476_vm0, %v5829_v7 }
 0x1ce   : > { %v5531_v33 = vpack.c.bf16 %v1346_v25, %v1345_v26  ;;  %v1331_v38 = vadd.f32 %v5951_v63, %v1270_v31 }
 0x1cf   : > { %v1348_v41 = vmax.f32 %v1332_v29, 0.0 }
 0x1d0   : > { %v1347_v42 = vmax.f32 %v1331_v38, 0.0  ;;  %v5217_v43 = vpop.f32.mrb[16].mxu0  ;;  %5239 = vmatmul.mubr.msk.f32.vlgmr.msra.gmra.mrb[10].mxu1 %vm476_vm0, %v5841_v14  ;;  %5532 = vmatprep.subr.bf16.mxu1 %v5531_v33  ;;  %v2194_v38 = vld [vmem:[%s6555_s6] sm:$0xff] }
 0x1d1   : > { %v1334_v44 = vadd.f32 %v5217_v43, %v5951_v63  ;;  %v1280_v45 = vpop.f32.mrb[17].mxu0  ;;  %5534 = vmatpush3.bf16.msra.mxu1 %v5531_v33  ;;  %5245 = vmatprep.mubr.msk.f32.mxu1 %vm476_vm0, %v5846_v18 }
 0x1d2   : > { %v5535_v46 = vpack.c.bf16 %v1348_v41, %v1347_v42  ;;  %v1333_v47 = vadd.f32 %v5951_v63, %v1280_v45  ;;  %v2195_v41 = vld [vmem:[%s6555_s6 + $0x8] sm:$0xff]  ;;  %v2196_v42 = vld [vmem:[%s6555_s6 + $0x10] sm:$0xff] }
 0x1d3   : > { %v1350_v48 = vmax.f32 %v1334_v44, 0.0  ;;  %v5595_v43 = vpack.c.bf16 %v2195_v41, %v2194_v38  ;;  %v2197_v44 = vld [vmem:[%s6555_s6 + $0x18] sm:$0xff] }
 0x1d4   : > { %v1349_v49 = vmax.f32 %v1333_v47, 0.0  ;;  %v5220_v50 = vpop.f32.mrb[18].mxu0  ;;  %5246 = vmatmul.mubr.msk.f32.vlgmr.msra.gmra.mrb[12].mxu1 %vm476_vm0, %v5858_v23  ;;  %5536 = vmatprep.subr.bf16.mxu1 %v5535_v46  ;;  %v5599_v45 = vpack.c.bf16 %v2197_v44, %v2196_v42 }
 0x1d5   : > { %v1336_v51 = vadd.f32 %v5220_v50, %v5951_v63  ;;  %v1290_v52 = vpop.f32.mrb[19].mxu0  ;;  %5538 = vmatpush3.bf16.msra.mxu1 %v5535_v46  ;;  %5252 = vmatprep.mubr.msk.f32.mxu1 %vm476_vm0, %v5852_v21  ;;  %v6032_v46 = vld [vmem:[%s6554_s5] ss:$0 sm:$0xff] }
 0x1d6   : > { %v5539_v53 = vpack.c.bf16 %v1350_v48, %v1349_v49  ;;  %v1335_v54 = vadd.f32 %v5951_v63, %v1290_v52  ;;  %5596 = vmatprep.subr.bf16.mxu0 %v5595_v43 }
 0x1d7   : > { %v1352_v55 = vmax.f32 %v1336_v51, 0.0 }
 0x1d8   : > { %v1351_v56 = vmax.f32 %v1335_v54, 0.0  ;;  %v5223_v57 = vpop.f32.mrb[20].mxu0  ;;  %5253 = vmatmul.mubr.msk.f32.vlgmr.msra.gmra.mrb[14].mxu1 %vm476_vm0, %v5865_v27  ;;  %5540 = vmatprep.subr.bf16.mxu1 %v5539_v53 }
 0x1d9   : > { %v1338_v58 = vadd.f32 %v5223_v57, %v5951_v63  ;;  %v1300_v59 = vpop.f32.mrb[21].mxu0  ;;  %5542 = vmatpush3.bf16.msra.mxu1 %v5539_v53  ;;  %5259 = vmatprep.mubr.msk.f32.mxu1 %vm476_vm0, %v5872_v30 }
 0x1da   : > { %v5543_v60 = vpack.c.bf16 %v1352_v55, %v1351_v56  ;;  %v1337_v61 = vadd.f32 %v5951_v63, %v1300_v59 }
 0x1db   : > { %v1354_v62 = vmax.f32 %v1338_v58, 0.0 }
 0x1dc   : > { %v1353_v0 = vmax.f32 %v1337_v61, 0.0  ;;  %v5226_v1 = vpop.f32.mrb[22].mxu0  ;;  %5260 = vmatmul.mubr.msk.f32.vlgmr.msra.gmra.mrb[16].mxu1 %vm476_vm0, %v5882_v34  ;;  %5544 = vmatprep.subr.bf16.mxu1 %v5543_v60 }
 0x1dd   : > { %v1340_v3 = vadd.f32 %v5226_v1, %v5951_v63  ;;  %v1310_v4 = vpop.f32.mrb[23].mxu0  ;;  %5546 = vmatpush3.bf16.msra.mxu1 %v5543_v60  ;;  %5266 = vmatprep.mubr.msk.f32.mxu1 %vm476_vm0, %v5877_v32 }
 0x1de   : > { %v5547_v5 = vpack.c.bf16 %v1354_v62, %v1353_v0  ;;  %v1339_v6 = vadd.f32 %v5951_v63, %v1310_v4 }
 0x1df   : > { %v1356_v8 = vmax.f32 %v1340_v3, 0.0 }
 0x1e0   : > { %v1355_v9 = vmax.f32 %v1339_v6, 0.0  ;;  %5267 = vmatmul.mubr.msk.f32.vlgmr.msra.gmra.mrb[18].mxu1 %vm476_vm0, %v5887_v35  ;;  %5548 = vmatprep.subr.bf16.mxu1 %v5547_v5 }
 0x1e1   : > { %5550 = vmatpush3.bf16.msra.mxu1 %v5547_v5  ;;  %5273 = vmatprep.mubr.msk.f32.mxu1 %vm476_vm0, %v5892_v36 }
 0x1e2   : > { %v5551_v11 = vpack.c.bf16 %v1356_v8, %v1355_v9 }
 0x1e4   : > { %5274 = vmatmul.mubr.msk.f32.vlgmr.msra.gmra.mrb[20].mxu1 %vm476_vm0, %v5905_v39  ;;  %5552 = vmatprep.subr.bf16.mxu1 %v5551_v11 }
 0x1e5   : > { %5554 = vmatpush3.bf16.msra.mxu1 %v5551_v11  ;;  %5280 = vmatprep.mubr.msk.f32.mxu1 %vm476_vm0, %v5897_v37 }
 0x1e8   : > { %5281 = vmatmul.mubr.msk.f32.vlgmr.msra.gmra.mrb[22].mxu1 %vm476_vm0, %v5910_v40 }
 0x1e9   : > { %5319 = vmatprep.mubr.msk.f32.mxu1 %vm476_vm0, %v5822_v2 }
 0x29f   : > { %v5233_v63 = vpop.f32.mrb[8].mxu1 }
 0x2a0   : > { %v1428_v12 = vpop.f32.mrb[9].mxu1 }
 0x2a1   : > { %5291 = vmatprep.mubr.msk.f32.mxu0 %vm1962_vm2, %v1428_v12 }
 0x2a2   : > { %5292 = vmatmul.mubr.msk.f32.vlgmr.msra.gmra.mrb[24].mxu0 %vm1962_vm2, %v5233_v63 }
 0x2a3   : > { %v5240_v13 = vpop.f32.mrb[10].mxu1  ;;  %5598 = vmatpush3.bf16.msra.mxu0 %v5595_v43 }
 0x2a4   : > { %v1503_v15 = vpop.f32.mrb[11].mxu1  ;;  %5600 = vmatprep.subr.bf16.mxu0 %v5599_v45 }
 0x2a5   : > { %5294 = vmatprep.mubr.msk.f32.mxu0 %vm1962_vm2, %v1503_v15 }
 0x2a6   : > { %5295 = vmatmul.mubr.msk.f32.gmra.mrb[26].mxu0 %vm1962_vm2, %v5240_v13 }
 0x2a7   : > { %v5247_v16 = vpop.f32.mrb[12].mxu1  ;;  %5602 = vmatpush3.bf16.msra.mxu0 %v5599_v45 }
 0x2a8   : > { %v1578_v17 = vpop.f32.mrb[13].mxu1 }
 0x2a9   : > { %5297 = vmatprep.mubr.msk.f32.mxu0 %vm1962_vm2, %v1578_v17 }
 0x2aa   : > { %5298 = vmatmul.mubr.msk.f32.gmra.mrb[28].mxu0 %vm1962_vm2, %v5247_v16 }
 0x2ab   : > { %v5254_v19 = vpop.f32.mrb[14].mxu1 }
 0x2ac   : > { %v1653_v20 = vpop.f32.mrb[15].mxu1 }
 0x2ad   : > { %5300 = vmatprep.mubr.msk.f32.mxu0 %vm1962_vm2, %v1653_v20 }
 0x2ae   : > { %5301 = vmatmul.mubr.msk.f32.gmra.mrb[30].mxu0 %vm1962_vm2, %v5254_v19 }
 0x2af   : > { %v5261_v22 = vpop.f32.mrb[16].mxu1 }
 0x2b0   : > { %v1728_v24 = vpop.f32.mrb[17].mxu1 }
 0x2b1   : > { %5303 = vmatprep.mubr.msk.f32.mxu0 %vm1962_vm2, %v1728_v24 }
 0x2b2   : > { %5304 = vmatmul.mubr.msk.f32.gmra.mrb[32].mxu0 %vm1962_vm2, %v5261_v22 }
 0x2b3   : > { %v5268_v25 = vpop.f32.mrb[18].mxu1 }
 0x2b4   : > { %v1803_v26 = vpop.f32.mrb[19].mxu1 }
 0x2b5   : > { %5306 = vmatprep.mubr.msk.f32.mxu0 %vm1962_vm2, %v1803_v26 }
 0x2b6   : > { %5307 = vmatmul.mubr.msk.f32.gmra.mrb[34].mxu0 %vm1962_vm2, %v5268_v25 }
 0x2b7   : > { %v5275_v28 = vpop.f32.mrb[20].mxu1 }
 0x2b8   : > { %v1878_v29 = vpop.f32.mrb[21].mxu1 }
 0x2b9   : > { %5309 = vmatprep.mubr.msk.f32.mxu0 %vm1962_vm2, %v1878_v29 }
 0x2ba   : > { %5310 = vmatmul.mubr.msk.f32.gmra.mrb[36].mxu0 %vm1962_vm2, %v5275_v28 }
 0x2bb   : > { %v5282_v31 = vpop.f32.mrb[22].mxu1 }
 0x2bc   : > { %v1953_v33 = vpop.f32.mrb[23].mxu1 }
 0x2bd   : > { %5312 = vmatprep.mubr.msk.f32.mxu0 %vm1962_vm2, %v1953_v33 }
 0x2be   : > { %5313 = vmatmul.mubr.msk.f32.gmra.mrb[38].mxu0 %vm1962_vm2, %v5282_v31 }
 0x375   : > { %v5293_v47 = vpop.f32.mrb[24].mxu0 }
 0x376   : > { %v2163_v48 = vadd.f32 %v5293_v47, %v6032_v46  ;;  %v2077_v49 = vpop.f32.mrb[25].mxu0 }
 0x377   : > { %v2162_v50 = vadd.f32 %v6032_v46, %v2077_v49 }
 0x378   : > { %v2179_v51 = vmax.f32 %v2163_v48, 0.0 }
 0x379   : > { %v2178_v52 = vmax.f32 %v2162_v50, 0.0  ;;  %v5296_v53 = vpop.f32.mrb[26].mxu0 }
 0x37a   : > { %v2165_v54 = vadd.f32 %v5296_v53, %v6032_v46  ;;  %v2087_v55 = vpop.f32.mrb[27].mxu0 }
 0x37b   : > { %v5563_v56 = vpack.c.bf16 %v2179_v51, %v2178_v52  ;;  %v2164_v57 = vadd.f32 %v6032_v46, %v2087_v55 }
 0x37c   : > { %v2181_v58 = vmax.f32 %v2165_v54, 0.0 }
 0x37d   : > { %v2180_v59 = vmax.f32 %v2164_v57, 0.0  ;;  %v5299_v60 = vpop.f32.mrb[28].mxu0  ;;  %5564 = vmatprep.subr.bf16.mxu1 %v5563_v56 }
 0x37e   : > { %v2167_v61 = vadd.f32 %v5299_v60, %v6032_v46  ;;  %v2097_v62 = vpop.f32.mrb[29].mxu0  ;;  %5566 = vmatpush3.bf16.msra.mxu1 %v5563_v56 }
 0x37f   : > { %v5567_v0 = vpack.c.bf16 %v2181_v58, %v2180_v59  ;;  %v2166_v1 = vadd.f32 %v6032_v46, %v2097_v62 }
 0x380   : > { %v2183_v3 = vmax.f32 %v2167_v61, 0.0 }
 0x381   : > { %v2182_v4 = vmax.f32 %v2166_v1, 0.0  ;;  %v5302_v5 = vpop.f32.mrb[30].mxu0  ;;  %5320 = vmatmul.mubr.msk.f32.vlgmr.msra.gmra.mrb[24].mxu1 %vm476_vm0, %v5836_v10  ;;  %5568 = vmatprep.subr.bf16.mxu1 %v5567_v0 }
 0x382   : > { %v2169_v6 = vadd.f32 %v5302_v5, %v6032_v46  ;;  %v2107_v8 = vpop.f32.mrb[31].mxu0  ;;  %5570 = vmatpush3.bf16.msra.mxu1 %v5567_v0  ;;  %5326 = vmatprep.mubr.msk.f32.mxu1 %vm476_vm0, %v5829_v7 }
 0x383   : > { %v5571_v9 = vpack.c.bf16 %v2183_v3, %v2182_v4  ;;  %v2168_v11 = vadd.f32 %v6032_v46, %v2107_v8 }
 0x384   : > { %v2185_v63 = vmax.f32 %v2169_v6, 0.0 }
 0x385   : > { %v2184_v12 = vmax.f32 %v2168_v11, 0.0  ;;  %v5305_v13 = vpop.f32.mrb[32].mxu0  ;;  %5327 = vmatmul.mubr.msk.f32.vlgmr.msra.gmra.mrb[26].mxu1 %vm476_vm0, %v5841_v14  ;;  %5572 = vmatprep.subr.bf16.mxu1 %v5571_v9  ;;  %v3031_v11 = vld [vmem:[%s6557_s8 + $0x8] sm:$0xff] }
 0x386   : > { %v2171_v15 = vadd.f32 %v5305_v13, %v6032_v46  ;;  %v2117_v16 = vpop.f32.mrb[33].mxu0  ;;  %5574 = vmatpush3.bf16.msra.mxu1 %v5571_v9  ;;  %5333 = vmatprep.mubr.msk.f32.mxu1 %vm476_vm0, %v5846_v18  ;;  %v3030_v9 = vld [vmem:[%s6557_s8] sm:$0xff]  ;;  %v3033_v13 = vld [vmem:[%s6557_s8 + $0x18] sm:$0xff] }
 0x387   : > { %v5575_v17 = vpack.c.bf16 %v2185_v63, %v2184_v12  ;;  %v2170_v19 = vadd.f32 %v6032_v46, %v2117_v16  ;;  %v3032_v63 = vld [vmem:[%s6557_s8 + $0x10] sm:$0xff]  ;;  %v5635_v12 = vpack.c.bf16 %v3031_v11, %v3030_v9  ;;  %v6113_v16 = vld [vmem:[%s6556_s7] ss:$0 sm:$0xff] }
 0x388   : > { %v2187_v20 = vmax.f32 %v2171_v15, 0.0  ;;  %v5639_v15 = vpack.c.bf16 %v3033_v13, %v3032_v63 }
 0x389   : > { %v2186_v22 = vmax.f32 %v2170_v19, 0.0  ;;  %v5308_v24 = vpop.f32.mrb[34].mxu0  ;;  %5334 = vmatmul.mubr.msk.f32.vlgmr.msra.gmra.mrb[28].mxu1 %vm476_vm0, %v5858_v23  ;;  %5576 = vmatprep.subr.bf16.mxu1 %v5575_v17 }
 0x38a   : > { %v2173_v25 = vadd.f32 %v5308_v24, %v6032_v46  ;;  %v2127_v26 = vpop.f32.mrb[35].mxu0  ;;  %5578 = vmatpush3.bf16.msra.mxu1 %v5575_v17  ;;  %5340 = vmatprep.mubr.msk.f32.mxu1 %vm476_vm0, %v5852_v21 }
 0x38b   : > { %v5579_v28 = vpack.c.bf16 %v2187_v20, %v2186_v22  ;;  %v2172_v29 = vadd.f32 %v6032_v46, %v2127_v26  ;;  %5636 = vmatprep.subr.bf16.mxu0 %v5635_v12 }
 0x38c   : > { %v2189_v31 = vmax.f32 %v2173_v25, 0.0 }
 0x38d   : > { %v2188_v33 = vmax.f32 %v2172_v29, 0.0  ;;  %v5311_v38 = vpop.f32.mrb[36].mxu0  ;;  %5341 = vmatmul.mubr.msk.f32.vlgmr.msra.gmra.mrb[30].mxu1 %vm476_vm0, %v5865_v27  ;;  %5580 = vmatprep.subr.bf16.mxu1 %v5579_v28 }
 0x38e   : > { %v2175_v41 = vadd.f32 %v5311_v38, %v6032_v46  ;;  %v2137_v42 = vpop.f32.mrb[37].mxu0  ;;  %5582 = vmatpush3.bf16.msra.mxu1 %v5579_v28  ;;  %5347 = vmatprep.mubr.msk.f32.mxu1 %vm476_vm0, %v5872_v30 }
 0x38f   : > { %v5583_v43 = vpack.c.bf16 %v2189_v31, %v2188_v33  ;;  %v2174_v44 = vadd.f32 %v6032_v46, %v2137_v42 }
 0x390   : > { %v2191_v45 = vmax.f32 %v2175_v41, 0.0 }
 0x391   : > { %v2190_v47 = vmax.f32 %v2174_v44, 0.0  ;;  %v5314_v48 = vpop.f32.mrb[38].mxu0  ;;  %5348 = vmatmul.mubr.msk.f32.vlgmr.msra.gmra.mrb[32].mxu1 %vm476_vm0, %v5882_v34  ;;  %5584 = vmatprep.subr.bf16.mxu1 %v5583_v43 }
 0x392   : > { %v2177_v49 = vadd.f32 %v5314_v48, %v6032_v46  ;;  %v2147_v50 = vpop.f32.mrb[39].mxu0  ;;  %5586 = vmatpush3.bf16.msra.mxu1 %v5583_v43  ;;  %5354 = vmatprep.mubr.msk.f32.mxu1 %vm476_vm0, %v5877_v32 }
 0x393   : > { %v5587_v51 = vpack.c.bf16 %v2191_v45, %v2190_v47  ;;  %v2176_v52 = vadd.f32 %v6032_v46, %v2147_v50 }
 0x394   : > { %v2193_v53 = vmax.f32 %v2177_v49, 0.0 }
 0x395   : > { %v2192_v54 = vmax.f32 %v2176_v52, 0.0  ;;  %5355 = vmatmul.mubr.msk.f32.vlgmr.msra.gmra.mrb[34].mxu1 %vm476_vm0, %v5887_v35  ;;  %5588 = vmatprep.subr.bf16.mxu1 %v5587_v51 }
 0x396   : > { %5590 = vmatpush3.bf16.msra.mxu1 %v5587_v51  ;;  %5361 = vmatprep.mubr.msk.f32.mxu1 %vm476_vm0, %v5892_v36 }
 0x397   : > { %v5591_v55 = vpack.c.bf16 %v2193_v53, %v2192_v54 }
 0x399   : > { %5362 = vmatmul.mubr.msk.f32.vlgmr.msra.gmra.mrb[36].mxu1 %vm476_vm0, %v5905_v39  ;;  %5592 = vmatprep.subr.bf16.mxu1 %v5591_v55 }
 0x39a   : > { %5594 = vmatpush3.bf16.msra.mxu1 %v5591_v55  ;;  %5368 = vmatprep.mubr.msk.f32.mxu1 %vm476_vm0, %v5897_v37 }
 0x39d   : > { %5369 = vmatmul.mubr.msk.f32.vlgmr.msra.gmra.mrb[38].mxu1 %vm476_vm0, %v5910_v40 }
 0x39e   : > { %5407 = vmatprep.mubr.msk.f32.mxu1 %vm476_vm0, %v5822_v2 }
 0x454   : > { %v5321_v46 = vpop.f32.mrb[24].mxu1 }
 0x455   : > { %v2265_v56 = vpop.f32.mrb[25].mxu1 }
 0x456   : > { %5379 = vmatprep.mubr.msk.f32.mxu0 %vm1962_vm2, %v2265_v56 }
 0x457   : > { %5380 = vmatmul.mubr.msk.f32.vlgmr.msra.gmra.mrb[40].mxu0 %vm1962_vm2, %v5321_v46 }
 0x458   : > { %v5328_v57 = vpop.f32.mrb[26].mxu1  ;;  %5638 = vmatpush3.bf16.msra.mxu0 %v5635_v12 }
 0x459   : > { %v2340_v58 = vpop.f32.mrb[27].mxu1  ;;  %5640 = vmatprep.subr.bf16.mxu0 %v5639_v15 }
 0x45a   : > { %5382 = vmatprep.mubr.msk.f32.mxu0 %vm1962_vm2, %v2340_v58 }
 0x45b   : > { %5383 = vmatmul.mubr.msk.f32.gmra.mrb[42].mxu0 %vm1962_vm2, %v5328_v57 }
 0x45c   : > { %v5335_v59 = vpop.f32.mrb[28].mxu1  ;;  %5642 = vmatpush3.bf16.msra.mxu0 %v5639_v15 }
 0x45d   : > { %v2415_v60 = vpop.f32.mrb[29].mxu1 }
 0x45e   : > { %5385 = vmatprep.mubr.msk.f32.mxu0 %vm1962_vm2, %v2415_v60 }
 0x45f   : > { %5386 = vmatmul.mubr.msk.f32.gmra.mrb[44].mxu0 %vm1962_vm2, %v5335_v59 }
 0x460   : > { %v5342_v61 = vpop.f32.mrb[30].mxu1 }
 0x461   : > { %v2490_v2 = vpop.f32.mrb[31].mxu1 }
 0x462   : > { %5388 = vmatprep.mubr.msk.f32.mxu0 %vm1962_vm2, %v2490_v2 }
 0x463   : > { %5389 = vmatmul.mubr.msk.f32.gmra.mrb[46].mxu0 %vm1962_vm2, %v5342_v61 }
 0x464   : > { %v5349_v62 = vpop.f32.mrb[32].mxu1 }
 0x465   : > { %v2565_v0 = vpop.f32.mrb[33].mxu1 }
 0x466   : > { %5391 = vmatprep.mubr.msk.f32.mxu0 %vm1962_vm2, %v2565_v0 }
 0x467   : > { %5392 = vmatmul.mubr.msk.f32.gmra.mrb[48].mxu0 %vm1962_vm2, %v5349_v62 }
 0x468   : > { %v5356_v1 = vpop.f32.mrb[34].mxu1 }
 0x469   : > { %v2640_v3 = vpop.f32.mrb[35].mxu1 }
 0x46a   : > { %5394 = vmatprep.mubr.msk.f32.mxu0 %vm1962_vm2, %v2640_v3 }
 0x46b   : > { %5395 = vmatmul.mubr.msk.f32.gmra.mrb[50].mxu0 %vm1962_vm2, %v5356_v1 }
 0x46c   : > { %v5363_v4 = vpop.f32.mrb[36].mxu1 }
 0x46d   : > { %v2715_v5 = vpop.f32.mrb[37].mxu1 }
 0x46e   : > { %5397 = vmatprep.mubr.msk.f32.mxu0 %vm1962_vm2, %v2715_v5 }
 0x46f   : > { %5398 = vmatmul.mubr.msk.f32.gmra.mrb[52].mxu0 %vm1962_vm2, %v5363_v4 }
 0x470   : > { %v5370_v6 = vpop.f32.mrb[38].mxu1 }
 0x471   : > { %v2790_v8 = vpop.f32.mrb[39].mxu1 }
 0x472   : > { %5400 = vmatprep.mubr.msk.f32.mxu0 %vm1962_vm2, %v2790_v8 }
 0x473   : > { %5401 = vmatmul.mubr.msk.f32.gmra.mrb[54].mxu0 %vm1962_vm2, %v5370_v6 }
 0x52a   : > { %v5381_v17 = vpop.f32.mrb[40].mxu0 }
 0x52b   : > { %v2999_v19 = vadd.f32 %v5381_v17, %v6113_v16  ;;  %v2913_v20 = vpop.f32.mrb[41].mxu0 }
 0x52c   : > { %v2998_v22 = vadd.f32 %v6113_v16, %v2913_v20 }
 0x52d   : > { %v3015_v24 = vmax.f32 %v2999_v19, 0.0 }
 0x52e   : > { %v3014_v25 = vmax.f32 %v2998_v22, 0.0  ;;  %v5384_v26 = vpop.f32.mrb[42].mxu0 }
 0x52f   : > { %v3001_v28 = vadd.f32 %v5384_v26, %v6113_v16  ;;  %v2923_v29 = vpop.f32.mrb[43].mxu0 }
 0x530   : > { %v5603_v31 = vpack.c.bf16 %v3015_v24, %v3014_v25  ;;  %v3000_v33 = vadd.f32 %v6113_v16, %v2923_v29  ;;  %v4448_v29 = vld [vmem:[%s6559_s10 + $0x80] sm:$0xff] }
 0x531   : > { %v3017_v38 = vmax.f32 %v3001_v28, 0.0 }
 0x532   : > { %v3016_v41 = vmax.f32 %v3000_v33, 0.0  ;;  %v5387_v42 = vpop.f32.mrb[44].mxu0  ;;  %5604 = vmatprep.subr.bf16.mxu1 %v5603_v31  ;;  %v4432_v33 = vld [vmem:[%s6559_s10] sm:$0xff] }
 0x533   : > { %v3003_v43 = vadd.f32 %v5387_v42, %v6113_v16  ;;  %v2933_v44 = vpop.f32.mrb[45].mxu0  ;;  %5606 = vmatpush3.bf16.msra.mxu1 %v5603_v31  ;;  %v4449_v31 = vld [vmem:[%s6559_s10 + $0x88] sm:$0xff]  ;;  %v4450_v42 = vld [vmem:[%s6559_s10 + $0x90] sm:$0xff] }
 0x534   : > { %v5607_v45 = vpack.c.bf16 %v3017_v38, %v3016_v41  ;;  %v3002_v47 = vadd.f32 %v6113_v16, %v2933_v44  ;;  %v5643_v38 = vpack.c.bf16 %v4449_v31, %v4448_v29  ;;  %v4433_v41 = vld [vmem:[%s6559_s10 + $0x8] sm:$0xff] }
 0x535   : > { %v3019_v48 = vmax.f32 %v3003_v43, 0.0  ;;  %v4451_v43 = vld [vmem:[%s6559_s10 + $0x98] sm:$0xff]  ;;  %v5645_v44 = vpack.c.bf16 %v4433_v41, %v4432_v33 }
 0x536   : > { %v3018_v49 = vmax.f32 %v3002_v47, 0.0  ;;  %v5390_v50 = vpop.f32.mrb[46].mxu0  ;;  %5408 = vmatmul.mubr.msk.f32.vlgmr.msra.gmra.mrb[40].mxu1 %vm476_vm0, %v5836_v10  ;;  %5608 = vmatprep.subr.bf16.mxu1 %v5607_v45  ;;  %v4480_v47 = vld [vmem:[%s6559_s10 + $0x180] sm:$0xff] }
 0x537   : > { %v3005_v51 = vadd.f32 %v5390_v50, %v6113_v16  ;;  %v2943_v52 = vpop.f32.mrb[47].mxu0  ;;  %5610 = vmatpush3.bf16.msra.mxu1 %v5607_v45  ;;  %5414 = vmatprep.mubr.msk.f32.mxu1 %vm476_vm0, %v5829_v7  ;;  %v5647_v45 = vpack.c.bf16 %v4451_v43, %v4450_v42 }
 0x538   : > { %v5611_v53 = vpack.c.bf16 %v3019_v48, %v3018_v49  ;;  %v3004_v54 = vadd.f32 %v6113_v16, %v2943_v52  ;;  %v4481_v48 = vld [vmem:[%s6559_s10 + $0x188] sm:$0xff]  ;;  %v4434_v49 = vld [vmem:[%s6559_s10 + $0x10] sm:$0xff]  ;;  %v4464_v52 = vld [vmem:[%s6559_s10 + $0x100] sm:$0xff] }
 0x539   : > { %v3021_v55 = vmax.f32 %v3005_v51, 0.0  ;;  %v5675_v50 = vpack.c.bf16 %v4481_v48, %v4480_v47  ;;  %v4435_v51 = vld [vmem:[%s6559_s10 + $0x18] sm:$0xff] }
 0x53a   : > { %v3020_v46 = vmax.f32 %v3004_v54, 0.0  ;;  %v5393_v56 = vpop.f32.mrb[48].mxu0  ;;  %5415 = vmatmul.mubr.msk.f32.vlgmr.msra.gmra.mrb[42].mxu1 %vm476_vm0, %v5841_v14  ;;  %5612 = vmatprep.subr.bf16.mxu1 %v5611_v53  ;;  %v5649_v54 = vpack.c.bf16 %v4435_v51, %v4434_v49 }
 0x53b   : > { %v3007_v10 = vadd.f32 %v5393_v56, %v6113_v16  ;;  %v2953_v57 = vpop.f32.mrb[49].mxu0  ;;  %5614 = vmatpush3.bf16.msra.mxu1 %v5611_v53  ;;  %5421 = vmatprep.mubr.msk.f32.mxu1 %vm476_vm0, %v5846_v18  ;;  %v4465_v53 = vld [vmem:[%s6559_s10 + $0x108] sm:$0xff] }
 0x53c   : > { %v5615_v58 = vpack.c.bf16 %v3021_v55, %v3020_v46  ;;  %v3006_v7 = vadd.f32 %v6113_v16, %v2953_v57  ;;  %v5677_v55 = vpack.c.bf16 %v4465_v53, %v4464_v52  ;;  %5676 = vmatprep.subr.bf16.mxu0 %v5675_v50  ;;  %v6216_v46 = vld [vmem:[%s6558_s9] ss:$0 sm:$0xff] }
 0x53d   : > { %v3023_v59 = vmax.f32 %v3007_v10, 0.0 }
 0x53e   : > { %v3022_v60 = vmax.f32 %v3006_v7, 0.0  ;;  %v5396_v61 = vpop.f32.mrb[50].mxu0  ;;  %5422 = vmatmul.mubr.msk.f32.vlgmr.msra.gmra.mrb[44].mxu1 %vm476_vm0, %v5858_v23  ;;  %5616 = vmatprep.subr.bf16.mxu1 %v5615_v58 }
 0x53f   : > { %v3009_v14 = vadd.f32 %v5396_v61, %v6113_v16  ;;  %v2963_v2 = vpop.f32.mrb[51].mxu0  ;;  %5618 = vmatpush3.bf16.msra.mxu1 %v5615_v58  ;;  %5428 = vmatprep.mubr.msk.f32.mxu1 %vm476_vm0, %v5852_v21 }
 0x540   : > { %v5619_v62 = vpack.c.bf16 %v3023_v59, %v3022_v60  ;;  %v3008_v18 = vadd.f32 %v6113_v16, %v2963_v2 }
 0x541   : > { %v3025_v0 = vmax.f32 %v3009_v14, 0.0 }
 0x542   : > { %v3024_v1 = vmax.f32 %v3008_v18, 0.0  ;;  %v5399_v3 = vpop.f32.mrb[52].mxu0  ;;  %5429 = vmatmul.mubr.msk.f32.vlgmr.msra.gmra.mrb[46].mxu1 %vm476_vm0, %v5865_v27  ;;  %5620 = vmatprep.subr.bf16.mxu1 %v5619_v62 }
 0x543   : > { %v3011_v23 = vadd.f32 %v5399_v3, %v6113_v16  ;;  %v2973_v4 = vpop.f32.mrb[53].mxu0  ;;  %5622 = vmatpush3.bf16.msra.mxu1 %v5619_v62  ;;  %5435 = vmatprep.mubr.msk.f32.mxu1 %vm476_vm0, %v5872_v30 }
 0x544   : > { %v5623_v5 = vpack.c.bf16 %v3025_v0, %v3024_v1  ;;  %v3010_v21 = vadd.f32 %v6113_v16, %v2973_v4 }
 0x545   : > { %v3027_v6 = vmax.f32 %v3011_v23, 0.0 }
 0x546   : > { %v3026_v8 = vmax.f32 %v3010_v21, 0.0  ;;  %v5402_v9 = vpop.f32.mrb[54].mxu0  ;;  %5436 = vmatmul.mubr.msk.f32.vlgmr.msra.gmra.mrb[48].mxu1 %vm476_vm0, %v5882_v34  ;;  %5624 = vmatprep.subr.bf16.mxu1 %v5623_v5 }
 0x547   : > { %v3013_v27 = vadd.f32 %v5402_v9, %v6113_v16  ;;  %v2983_v11 = vpop.f32.mrb[55].mxu0  ;;  %5626 = vmatpush3.bf16.msra.mxu1 %v5623_v5  ;;  %5442 = vmatprep.mubr.msk.f32.mxu1 %vm476_vm0, %v5877_v32 }
 0x548   : > { %v5627_v63 = vpack.c.bf16 %v3027_v6, %v3026_v8  ;;  %v3012_v30 = vadd.f32 %v6113_v16, %v2983_v11 }
 0x549   : > { %v3029_v12 = vmax.f32 %v3013_v27, 0.0 }
 0x54a   : > { %v3028_v13 = vmax.f32 %v3012_v30, 0.0  ;;  %5443 = vmatmul.mubr.msk.f32.vlgmr.msra.gmra.mrb[50].mxu1 %vm476_vm0, %v5887_v35  ;;  %5628 = vmatprep.subr.bf16.mxu1 %v5627_v63 }
 0x54b   : > { %5630 = vmatpush3.bf16.msra.mxu1 %v5627_v63  ;;  %5449 = vmatprep.mubr.msk.f32.mxu1 %vm476_vm0, %v5892_v36 }
 0x54c   : > { %v5631_v34 = vpack.c.bf16 %v3029_v12, %v3028_v13 }
 0x54e   : > { %5450 = vmatmul.mubr.msk.f32.vlgmr.msra.gmra.mrb[52].mxu1 %vm476_vm0, %v5905_v39  ;;  %5632 = vmatprep.subr.bf16.mxu1 %v5631_v34 }
 0x54f   : > { %5634 = vmatpush3.bf16.msra.mxu1 %v5631_v34  ;;  %5456 = vmatprep.mubr.msk.f32.mxu1 %vm476_vm0, %v5897_v37 }
 0x550   : > { %5644 = vmatprep.subr.bf16.mxu1 %v5643_v38 }
 0x552   : > { %5457 = vmatmul.mubr.msk.f32.vlgmr.msra.gmra.mrb[54].mxu1 %vm476_vm0, %v5910_v40 }
 0x553   : > { %5646 = vmatpush3.bf16.msra.mxu1 %v5645_v44 }
 0x554   : > { %5648 = vmatprep.subr.bf16.mxu1 %v5647_v45 }
 0x557   : > { %5650 = vmatpush3.bf16.msra.mxu1 %v5649_v54 }
 0x609   : > { %v5409_v32 = vpop.f32.mrb[40].mxu1 }
 0x60a   : > { %v3101_v15 = vpop.f32.mrb[41].mxu1 }
 0x60b   : > { %5467 = vmatprep.mubr.msk.f32.mxu0 %vm1962_vm2, %v3101_v15 }
 0x60c   : > { %5468 = vmatmul.mubr.msk.f32.vlgmr.msra.gmra.mrb[56].mxu0 %vm1962_vm2, %v5409_v32 }
 0x60d   : > { %v5416_v35 = vpop.f32.mrb[42].mxu1  ;;  %5678 = vmatpush3.bf16.msra.mxu0 %v5677_v55 }
 0x60e   : > { %v3176_v36 = vpop.f32.mrb[43].mxu1 }
 0x60f   : > { %5470 = vmatprep.mubr.msk.f32.mxu0 %vm1962_vm2, %v3176_v36 }
 0x610   : > { %5471 = vmatmul.mubr.msk.f32.gmra.mrb[58].mxu0 %vm1962_vm2, %v5416_v35 }
 0x611   : > { %v5423_v39 = vpop.f32.mrb[44].mxu1 }
 0x612   : > { %v3251_v16 = vpop.f32.mrb[45].mxu1 }
 0x613   : > { %5473 = vmatprep.mubr.msk.f32.mxu0 %vm1962_vm2, %v3251_v16 }
 0x614   : > { %5474 = vmatmul.mubr.msk.f32.gmra.mrb[60].mxu0 %vm1962_vm2, %v5423_v39 }
 0x615   : > { %v5430_v37 = vpop.f32.mrb[46].mxu1 }
 0x616   : > { %v3326_v40 = vpop.f32.mrb[47].mxu1 }
 0x617   : > { %5476 = vmatprep.mubr.msk.f32.mxu0 %vm1962_vm2, %v3326_v40 }
 0x618   : > { %5477 = vmatmul.mubr.msk.f32.gmra.mrb[62].mxu0 %vm1962_vm2, %v5430_v37 }
 0x619   : > { %v5437_v17 = vpop.f32.mrb[48].mxu1 }
 0x61a   : > { %v3401_v19 = vpop.f32.mrb[49].mxu1 }
 0x61b   : > { %5479 = vmatprep.mubr.msk.f32.mxu0 %vm1962_vm2, %v3401_v19 }
 0x61c   : > { %5480 = vmatmul.mubr.msk.f32.gmra.mrb[64].mxu0 %vm1962_vm2, %v5437_v17 }
 0x61d   : > { %v5444_v20 = vpop.f32.mrb[50].mxu1 }
 0x61e   : > { %v3476_v22 = vpop.f32.mrb[51].mxu1 }
 0x61f   : > { %5482 = vmatprep.mubr.msk.f32.mxu0 %vm1962_vm2, %v3476_v22 }
 0x620   : > { %5483 = vmatmul.mubr.msk.f32.gmra.mrb[66].mxu0 %vm1962_vm2, %v5444_v20 }
 0x621   : > { %v5451_v24 = vpop.f32.mrb[52].mxu1 }
 0x622   : > { %v3551_v25 = vpop.f32.mrb[53].mxu1 }
 0x623   : > { %5485 = vmatprep.mubr.msk.f32.mxu0 %vm1962_vm2, %v3551_v25 }
 0x624   : > { %5486 = vmatmul.mubr.msk.f32.gmra.mrb[68].mxu0 %vm1962_vm2, %v5451_v24 }
 0x625   : > { %v5458_v26 = vpop.f32.mrb[54].mxu1 }
 0x626   : > { %v3626_v28 = vpop.f32.mrb[55].mxu1 }
 0x627   : > { %5488 = vmatprep.mubr.msk.f32.mxu0 %vm1962_vm2, %v3626_v28 }
 0x628   : > { %5489 = vmatmul.mubr.msk.f32.gmra.mrb[70].mxu0 %vm1962_vm2, %v5458_v26 }
 0x6df   : > { %v5469_v56 = vpop.f32.mrb[56].mxu0 }
 0x6e0   : > { %v3835_v10 = vadd.f32 %v5469_v56, %v6216_v46  ;;  %v3749_v57 = vpop.f32.mrb[57].mxu0 }
 0x6e1   : > { %v3834_v58 = vadd.f32 %v6216_v46, %v3749_v57 }
 0x6e2   : > { %v3851_v7 = vmax.f32 %v3835_v10, 0.0 }
 0x6e3   : > { %v3850_v59 = vmax.f32 %v3834_v58, 0.0  ;;  %v5472_v60 = vpop.f32.mrb[58].mxu0 }
 0x6e4   : > { %3867 = vst.msk [vmem:[#allocation2 + $0x8] sm:$0xff] %vm1962_vm2, %v3851_v7  ;;  %v3837_v61 = vadd.f32 %v5472_v60, %v6216_v46  ;;  %v3759_v14 = vpop.f32.mrb[59].mxu0 }
 0x6e5   : > { %3866 = vst.msk [vmem:[#allocation2] sm:$0xff] %vm1962_vm2, %v3850_v59  ;;  %v3836_v2 = vadd.f32 %v6216_v46, %v3759_v14 }
 0x6e6   : > { %v3853_v62 = vmax.f32 %v3837_v61, 0.0 }
 0x6e7   : > { %v3852_v18 = vmax.f32 %v3836_v2, 0.0  ;;  %v5475_v0 = vpop.f32.mrb[60].mxu0 }
 0x6e8   : > { %3869 = vst.msk [vmem:[#allocation2 + $0x18] sm:$0xff] %vm1962_vm2, %v3853_v62  ;;  %v3839_v1 = vadd.f32 %v5475_v0, %v6216_v46  ;;  %v3769_v3 = vpop.f32.mrb[61].mxu0 }
 0x6e9   : > { %3868 = vst.msk [vmem:[#allocation2 + $0x10] sm:$0xff] %vm1962_vm2, %v3852_v18  ;;  %v3838_v23 = vadd.f32 %v6216_v46, %v3769_v3 }
 0x6ea   : > { %v3855_v4 = vmax.f32 %v3839_v1, 0.0 }
 0x6eb   : > { %v3854_v5 = vmax.f32 %v3838_v23, 0.0  ;;  %v5478_v21 = vpop.f32.mrb[62].mxu0  ;;  %v4360_v26 = vld [vmem:[#allocation2 + $0xe] sm:$0x1]  ;;  %v4326_v28 = vld [vmem:[#allocation2 + $0xd] sm:$0x1] }
 0x6ec   : > { %3871 = vst.msk [vmem:[#allocation2 + $0x28] sm:$0xff] %vm1962_vm2, %v3855_v4  ;;  %v3841_v6 = vadd.f32 %v5478_v21, %v6216_v46  ;;  %v3779_v8 = vpop.f32.mrb[63].mxu0  ;;  %v4192_v43 = vld [vmem:[#allocation2 + $0x9] sm:$0x1]  ;;  %v4058_v55 = vld [vmem:[#allocation2 + $0x5] sm:$0x1] }
 0x6ed   : > { %3870 = vst.msk [vmem:[#allocation2 + $0x20] sm:$0xff] %vm1962_vm2, %v3854_v5  ;;  %v3840_v9 = vadd.f32 %v6216_v46, %v3779_v8  ;;  %v4226_v18 = vld [vmem:[#allocation2 + $0xa] sm:$0x1] }
 0x6ee   : > { %v3857_v27 = vmax.f32 %v3841_v6, 0.0 }
 0x6ef   : > { %v3856_v11 = vmax.f32 %v3840_v9, 0.0  ;;  %v5481_v63 = vpop.f32.mrb[64].mxu0  ;;  %v4361_v34 = vld [vmem:[#allocation2 + $0x1e] sm:$0x1]  ;;  %v4327_v32 = vld [vmem:[#allocation2 + $0x1d] sm:$0x1] }
 0x6f0   : > { %3873 = vst.msk [vmem:[#allocation2 + $0x38] sm:$0xff] %vm1962_vm2, %v3857_v27  ;;  %v3843_v30 = vadd.f32 %v5481_v63, %v6216_v46  ;;  %v3789_v12 = vpop.f32.mrb[65].mxu0  ;;  %v4193_v35 = vld [vmem:[#allocation2 + $0x19] sm:$0x1]  ;;  %v4059_v36 = vld [vmem:[#allocation2 + $0x15] sm:$0x1] }
 0x6f1   : > { %3872 = vst.msk [vmem:[#allocation2 + $0x30] sm:$0xff] %vm1962_vm2, %v3856_v11  ;;  %v3842_v13 = vadd.f32 %v6216_v46, %v3789_v12  ;;  %v4376_v20 = vrot.slane %v4361_v34, 7  ;;  %v4342_v22 = vrot.slane %v4327_v32, 7  ;;  %v4208_v29 = vrot.slane %v4193_v35, 7  ;;  %v4227_v33 = vld [vmem:[#allocation2 + $0x1a] sm:$0x1] }
 0x6f2   : > { %v3859_v15 = vmax.f32 %v3843_v30, 0.0  ;;  %v4074_v31 = vrot.slane %v4059_v36, 7  ;;  %v4242_v60 = vrot.slane %v4227_v33, 7 }
 0x6f3   : > { %v3858_v39 = vmax.f32 %v3842_v13, 0.0  ;;  %v5484_v16 = vpop.f32.mrb[66].mxu0  ;;  %v4362_v37 = vld [vmem:[#allocation2 + $0x2e] sm:$0x1]  ;;  %v4328_v40 = vld [vmem:[#allocation2 + $0x2d] sm:$0x1]  ;;  %v4377_v53 = vsel %vm3899_vm3, %v4376_v20, %v4360_v26  ;;  %v4343_v54 = vsel %vm3899_vm3, %v4342_v22, %v4326_v28  ;;  %v4209_v58 = vsel %vm3899_vm3, %v4208_v29, %v4192_v43 }
 0x6f4   : > { %3875 = vst.msk [vmem:[#allocation2 + $0x48] sm:$0xff] %vm1962_vm2, %v3859_v15  ;;  %v3845_v17 = vadd.f32 %v5484_v16, %v6216_v46  ;;  %v3799_v19 = vpop.f32.mrb[67].mxu0  ;;  %v4194_v24 = vld [vmem:[#allocation2 + $0x29] sm:$0x1]  ;;  %v4378_v41 = vrot.slane %v4362_v37, 6  ;;  %v4344_v42 = vrot.slane %v4328_v40, 6  ;;  %v4075_v59 = vsel %vm3899_vm3, %v4074_v31, %v4058_v55 }
 0x6f5   : > { %3874 = vst.msk [vmem:[#allocation2 + $0x40] sm:$0xff] %vm1962_vm2, %v3858_v39  ;;  %v3844_v25 = vadd.f32 %v6216_v46, %v3799_v19  ;;  %v4210_v44 = vrot.slane %v4194_v24, 6  ;;  %v4060_v45 = vld [vmem:[#allocation2 + $0x25] sm:$0x1]  ;;  %v4228_v56 = vld [vmem:[#allocation2 + $0x2a] sm:$0x1]  ;;  %v4243_v35 = vsel %vm3899_vm3, %v4242_v60, %v4226_v18 }
 0x6f6   : > { %v3861_v38 = vmax.f32 %v3845_v17, 0.0  ;;  %v4076_v62 = vrot.slane %v4060_v45, 6  ;;  %v4379_v4 = vsel %vm3902_vm4, %v4378_v41, %v4377_v53  ;;  %v4345_v21 = vsel %vm3902_vm4, %v4344_v42, %v4343_v54  ;;  %v3922_v40 = vld [vmem:[#allocation2 + $0x11] sm:$0x1] }
 0x6f7   : > { %v3860_v47 = vmax.f32 %v3844_v25, 0.0  ;;  %v5487_v48 = vpop.f32.mrb[68].mxu0  ;;  %v4363_v49 = vld [vmem:[#allocation2 + $0x3e] sm:$0x1]  ;;  %v4329_v50 = vld [vmem:[#allocation2 + $0x3d] sm:$0x1]  ;;  %v4211_v6 = vsel %vm3902_vm4, %v4210_v44, %v4209_v58 }
 0x6f8   : > { %3877 = vst.msk [vmem:[#allocation2 + $0x58] sm:$0xff] %vm1962_vm2, %v3861_v38  ;;  %v3847_v51 = vadd.f32 %v5487_v48, %v6216_v46  ;;  %v3809_v52 = vpop.f32.mrb[69].mxu0  ;;  %v4195_v57 = vld [vmem:[#allocation2 + $0x39] sm:$0x1]  ;;  %v4061_v7 = vld [vmem:[#allocation2 + $0x35] sm:$0x1]  ;;  %v4077_v24 = vsel %vm3902_vm4, %v4076_v62, %v4075_v59 }
 0x6f9   : > { %3876 = vst.msk [vmem:[#allocation2 + $0x50] sm:$0xff] %vm1962_vm2, %v3860_v47  ;;  %v3846_v10 = vadd.f32 %v6216_v46, %v3809_v52  ;;  %v4380_v14 = vrot.slane %v4363_v49, 5  ;;  %v4346_v2 = vrot.slane %v4329_v50, 5  ;;  %v4229_v0 = vld [vmem:[#allocation2 + $0x3a] sm:$0x1]  ;;  %v4212_v11 = vrot.slane %v4195_v57, 5 }
 0x6fa   : > { %v3863_v61 = vmax.f32 %v3847_v51, 0.0  ;;  %v4078_v63 = vrot.slane %v4061_v7, 5  ;;  %v4244_v30 = vrot.slane %v4228_v56, 6  ;;  %v4246_v37 = vrot.slane %v4229_v0, 5  ;;  %v3923_v49 = vld [vmem:[#allocation2 + $0x21] sm:$0x1] }
 0x6fb   : > { %v3862_v1 = vmax.f32 %v3846_v10, 0.0  ;;  %v5490_v3 = vpop.f32.mrb[70].mxu0  ;;  %v4364_v23 = vld [vmem:[#allocation2 + $0x4e] sm:$0x1]  ;;  %v4330_v5 = vld [vmem:[#allocation2 + $0x4d] sm:$0x1]  ;;  %v4381_v20 = vsel %vm3905_vm5, %v4380_v14, %v4379_v4  ;;  %v4347_v26 = vsel %vm3905_vm5, %v4346_v2, %v4345_v21  ;;  %v4213_v29 = vsel %vm3905_vm5, %v4212_v11, %v4211_v6 }
 0x6fc   : > { %3879 = vst.msk [vmem:[#allocation2 + $0x68] sm:$0xff] %vm1962_vm2, %v3863_v61  ;;  %v3849_v8 = vadd.f32 %v5490_v3, %v6216_v46  ;;  %v3819_v9 = vpop.f32.mrb[71].mxu0  ;;  %v4196_v27 = vld [vmem:[#allocation2 + $0x49] sm:$0x1]  ;;  %v4382_v13 = vrot.slane %v4364_v23, 4  ;;  %v4348_v34 = vrot.slane %v4330_v5, 4  ;;  %v4245_v33 = vsel %vm3902_vm4, %v4244_v30, %v4243_v35 }
 0x6fd   : > { %3878 = vst.msk [vmem:[#allocation2 + $0x60] sm:$0xff] %vm1962_vm2, %v3862_v1  ;;  %v3848_v12 = vadd.f32 %v6216_v46, %v3819_v9  ;;  %v4062_v32 = vld [vmem:[#allocation2 + $0x45] sm:$0x1]  ;;  %v4230_v15 = vld [vmem:[#allocation2 + $0x4a] sm:$0x1]  ;;  %v4214_v39 = vrot.slane %v4196_v27, 4  ;;  %v4079_v43 = vsel %vm3905_vm5, %v4078_v63, %v4077_v24  ;;  %v4247_v47 = vsel %vm3905_vm5, %v4246_v37, %v4245_v33 }
 0x6fe   : > { %v3865_v36 = vmax.f32 %v3849_v8, 0.0  ;;  %v4080_v16 = vrot.slane %v4062_v32, 4  ;;  %v4248_v46 = vrot.slane %v4230_v15, 4  ;;  %v4383_v38 = vsel %vm3908_vm6, %v4382_v13, %v4381_v20  ;;  %v3921_v57 = vld [vmem:[#allocation2 + $0x1] sm:$0x1]  ;;  %v4453_v9 = vld [vmem:[%s6559_s10 + $0xa8] sm:$0xff] }
 0x6ff   : > { %v3864_v17 = vmax.f32 %v3848_v12, 0.0  ;;  %v4365_v19 = vld [vmem:[#allocation2 + $0x5e] sm:$0x1]  ;;  %v4331_v22 = vld [vmem:[#allocation2 + $0x5d] sm:$0x1]  ;;  %v3937_v50 = vrot.slane %v3922_v40, 7  ;;  %v4349_v53 = vsel %vm3908_vm6, %v4348_v34, %v4347_v26  ;;  %v4215_v55 = vsel %vm3908_vm6, %v4214_v39, %v4213_v29 }
 0x700   : > { %3881 = vst.msk [vmem:[#allocation2 + $0x78] sm:$0xff] %vm1962_vm2, %v3865_v36  ;;  %v4384_v25 = vrot.slane %v4365_v19, 3  ;;  %v4197_v28 = vld [vmem:[#allocation2 + $0x59] sm:$0x1]  ;;  %v4063_v31 = vld [vmem:[#allocation2 + $0x55] sm:$0x1]  ;;  %v4081_v56 = vsel %vm3908_vm6, %v4080_v16, %v4079_v43  ;;  %v4249_v10 = vsel %vm3908_vm6, %v4248_v46, %v4247_v47 }
 0x701   : > { %3880 = vst.msk [vmem:[#allocation2 + $0x70] sm:$0xff] %vm1962_vm2, %v3864_v17  ;;  %v4350_v41 = vrot.slane %v4331_v22, 3  ;;  %v4216_v42 = vrot.slane %v4197_v28, 3  ;;  %v4231_v44 = vld [vmem:[#allocation2 + $0x5a] sm:$0x1]  ;;  %v4082_v45 = vrot.slane %v4063_v31, 3  ;;  %v3938_v8 = vsel %vm3899_vm3, %v3937_v50, %v3921_v57 }
 0x702   : > { %v4250_v48 = vrot.slane %v4231_v44, 3  ;;  %v4385_v58 = vsel %vm3911_vm7, %v4384_v25, %v4383_v38  ;;  %v4452_v14 = vld [vmem:[%s6559_s10 + $0xa0] sm:$0xff]  ;;  %v3924_v1 = vld [vmem:[#allocation2 + $0x31] sm:$0x1]  ;;  %v3939_v3 = vrot.slane %v3923_v49, 6 }
 0x703   : > { %v4366_v51 = vld [vmem:[#allocation2 + $0x6e] sm:$0x1]  ;;  %v4332_v52 = vld [vmem:[#allocation2 + $0x6d] sm:$0x1]  ;;  %v4198_v54 = vld [vmem:[#allocation2 + $0x69] sm:$0x1]  ;;  %v4351_v2 = vsel %vm3911_vm7, %v4350_v41, %v4349_v53  ;;  %v4217_v62 = vsel %vm3911_vm7, %v4216_v42, %v4215_v55  ;;  %v4083_v23 = vsel %vm3911_vm7, %v4082_v45, %v4081_v56  ;;  %v5651_v15 = vpack.c.bf16 %v4453_v9, %v4452_v14 }
 0x704   : > { %v4386_v7 = vrot.slane %v4366_v51, 2  ;;  %v4352_v59 = vrot.slane %v4332_v52, 2  ;;  %v4218_v60 = vrot.slane %v4198_v54, 2  ;;  %v4064_v61 = vld [vmem:[#allocation2 + $0x65] sm:$0x1]  ;;  %v4251_v4 = vsel %vm3911_vm7, %v4250_v48, %v4249_v10 }
 0x705   : > { %v4084_v18 = vrot.slane %v4064_v61, 2  ;;  %v4232_v0 = vld [vmem:[#allocation2 + $0x6a] sm:$0x1]  ;;  %v3925_v21 = vld [vmem:[#allocation2 + $0x41] sm:$0x1]  ;;  %v3940_v25 = vsel %vm3902_vm4, %v3939_v3, %v3938_v8  ;;  %v3941_v26 = vrot.slane %v3924_v1, 5  ;;  %5652 = vmatprep.subr.bf16.mxu1 %v5651_v15 }
 0x706   : > { %v4252_v5 = vrot.slane %v4232_v0, 2  ;;  %v3926_v6 = vld [vmem:[#allocation2 + $0x51] sm:$0x1]  ;;  %v4387_v11 = vsel %vm3914_vm8, %v4386_v7, %v4385_v58  ;;  %v4353_v30 = vsel %vm3914_vm8, %v4352_v59, %v4351_v2  ;;  %v4219_v13 = vsel %vm3914_vm8, %v4218_v60, %v4217_v62  ;;  %v3927_v34 = vld [vmem:[#allocation2 + $0x61] sm:$0x1] }
 0x707   : > { %v4367_v27 = vld [vmem:[#allocation2 + $0x7e] sm:$0x1]  ;;  %v4333_v63 = vld [vmem:[#allocation2 + $0x7d] sm:$0x1]  ;;  %v4199_v12 = vld [vmem:[#allocation2 + $0x79] sm:$0x1]  ;;  %v4085_v37 = vsel %vm3914_vm8, %v4084_v18, %v4083_v23  ;;  %v3942_v43 = vsel %vm3905_vm5, %v3941_v26, %v3940_v25 }
 0x708   : > { %v4093_v32 = vld [vmem:[#allocation2 + $0x16] sm:$0x1]  ;;  %v4388_v35 = vrot.slane %v4367_v27, 1  ;;  %v4354_v36 = vrot.slane %v4333_v63, 1  ;;  %v4220_v39 = vrot.slane %v4199_v12, 1  ;;  %v4253_v24 = vsel %vm3914_vm8, %v4252_v5, %v4251_v4 }
 0x709   : > { %v4065_v16 = vld [vmem:[#allocation2 + $0x75] sm:$0x1]  ;;  %v4094_v40 = vld [vmem:[#allocation2 + $0x26] sm:$0x1]  ;;  %v4095_v17 = vld [vmem:[#allocation2 + $0x36] sm:$0x1] }
 0x70a   : > { %v4096_v19 = vld [vmem:[#allocation2 + $0x46] sm:$0x1]  ;;  %v4086_v20 = vrot.slane %v4065_v16, 1  ;;  %v4233_v22 = vld [vmem:[#allocation2 + $0x7a] sm:$0x1]  ;;  %v4389_v28 = vsel %vm3917_vm9, %v4388_v35, %v4387_v11  ;;  %v4355_v29 = vsel %vm3917_vm9, %v4354_v36, %v4353_v30  ;;  %v4221_v31 = vsel %vm3917_vm9, %v4220_v39, %v4219_v13 }
 0x70b   : > { %v3928_v46 = vld [vmem:[#allocation2 + $0x71] sm:$0x1]  ;;  %v4254_v33 = vrot.slane %v4233_v22, 1  ;;  %v4097_v38 = vld [vmem:[#allocation2 + $0x56] sm:$0x1]  ;;  %4390 = vrot.lane.b32.xlu0 %v4389_v28, %s5730_s29  ;;  %4356 = vrot.lane.b32.xlu1 %v4355_v29, %s5731_s30  ;;  %v3943_v44 = vrot.slane %v3925_v21, 4 }
 0x70c   : > { %v4127_v41 = vld [vmem:[#allocation2 + $0x17] sm:$0x1]  ;;  %v4087_v42 = vsel %vm3917_vm9, %v4086_v20, %v4085_v37  ;;  %v3945_v45 = vrot.slane %v3926_v6, 3  ;;  %v4092_v47 = vld [vmem:[#allocation2 + $0x6] sm:$0x1]  ;;  %v3947_v51 = vrot.slane %v3927_v34, 2 }
 0x70d   : > { %v4098_v48 = vld [vmem:[#allocation2 + $0x66] sm:$0x1]  ;;  %v4128_v49 = vld [vmem:[#allocation2 + $0x27] sm:$0x1]  ;;  %v4255_v50 = vsel %vm3917_vm9, %v4254_v33, %v4253_v24  ;;  %v3949_v52 = vrot.slane %v3928_v46, 1  ;;  %v4108_v54 = vrot.slane %v4093_v32, 7  ;;  %v3944_v55 = vsel %vm3908_vm6, %v3943_v44, %v3942_v43 }
 0x70e   : > { %v4099_v53 = vld [vmem:[#allocation2 + $0x76] sm:$0x1]  ;;  %v4110_v56 = vrot.slane %v4094_v40, 6  ;;  %v4112_v10 = vrot.slane %v4095_v17, 5  ;;  %v4114_v57 = vrot.slane %v4096_v19, 4  ;;  %v3946_v7 = vsel %vm3911_vm7, %v3945_v45, %v3944_v55 }
 0x70f   : > { %v4129_v58 = vld [vmem:[#allocation2 + $0x37] sm:$0x1]  ;;  %v4109_v59 = vsel %vm3899_vm3, %v4108_v54, %v4092_v47  ;;  %v4116_v60 = vrot.slane %v4097_v38, 3  ;;  %v4118_v61 = vrot.slane %v4098_v48, 2  ;;  %v4126_v14 = vld [vmem:[#allocation2 + $0x7] sm:$0x1]  ;;  %4222 = vrot.lane.b32.xlu1 %v4221_v31, %s5731_s30  ;;  %4088 = vrot.lane.b32.xlu0 %v4087_v42, %s5731_s30  ;;  %v3948_v18 = vsel %vm3914_vm8, %v3947_v51, %v3946_v7 }
 0x710   : > { %v4130_v2 = vld [vmem:[#allocation2 + $0x47] sm:$0x1]  ;;  %v4131_v62 = vld [vmem:[#allocation2 + $0x57] sm:$0x1]  ;;  %v4111_v0 = vsel %vm3902_vm4, %v4110_v56, %v4109_v59  ;;  %v4120_v1 = vrot.slane %v4099_v53, 1  ;;  %v4142_v4 = vrot.slane %v4127_v41, 7  ;;  %v3950_v5 = vsel %vm3917_vm9, %v3949_v52, %v3948_v18 }
 0x711   : > { %v4132_v3 = vld [vmem:[#allocation2 + $0x67] sm:$0x1]  ;;  %v4133_v23 = vld [vmem:[#allocation2 + $0x77] sm:$0x1]  ;;  %v4113_v21 = vsel %vm3905_vm5, %v4112_v10, %v4111_v0  ;;  %v4144_v6 = vrot.slane %v4128_v49, 6  ;;  %v4146_v8 = vrot.slane %v4129_v58, 5 }
 0x712   : > { %v3957_v9 = vld [vmem:[#allocation2 + $0x12] sm:$0x1]  ;;  %v3958_v27 = vld [vmem:[#allocation2 + $0x22] sm:$0x1]  ;;  %v4115_v11 = vsel %vm3908_vm6, %v4114_v57, %v4113_v21  ;;  %v4143_v63 = vsel %vm3899_vm3, %v4142_v4, %v4126_v14  ;;  %v4148_v30 = vrot.slane %v4130_v2, 4  ;;  %v4150_v12 = vrot.slane %v4131_v62, 3 }
 0x713   : > { %v3959_v13 = vld [vmem:[#allocation2 + $0x32] sm:$0x1]  ;;  %v3960_v34 = vld [vmem:[#allocation2 + $0x42] sm:$0x1]  ;;  %v4117_v32 = vsel %vm3911_vm7, %v4116_v60, %v4115_v11  ;;  %v4145_v15 = vsel %vm3902_vm4, %v4144_v6, %v4143_v63  ;;  %v4152_v35 = vrot.slane %v4132_v3, 2  ;;  %v4154_v36 = vrot.slane %v4133_v23, 1  ;;  %4256 = vrot.lane.b32.xlu1 %v4255_v50, %s5730_s29  ;;  %3951 = vrot.lane.b32.xlu0 %v3950_v5, %s5731_s30 }
 0x714   : > { %v3956_v39 = vld [vmem:[#allocation2 + $0x2] sm:$0x1]  ;;  %v3961_v16 = vld [vmem:[#allocation2 + $0x52] sm:$0x1]  ;;  %v4119_v40 = vsel %vm3914_vm8, %v4118_v61, %v4117_v32  ;;  %v4147_v17 = vsel %vm3905_vm5, %v4146_v8, %v4145_v15  ;;  %v3972_v20 = vrot.slane %v3957_v9, 7  ;;  %v3974_v22 = vrot.slane %v3958_v27, 6 }
 0x715   : > { %v3962_v37 = vld [vmem:[#allocation2 + $0x62] sm:$0x1]  ;;  %v3963_v19 = vld [vmem:[#allocation2 + $0x72] sm:$0x1]  ;;  %v3992_v24 = vld [vmem:[#allocation2 + $0x13] sm:$0x1]  ;;  %v4121_v46 = vsel %vm3917_vm9, %v4120_v1, %v4119_v40  ;;  %v4149_v25 = vsel %vm3908_vm6, %v4148_v30, %v4147_v17 }
 0x716   : > { %v3976_v26 = vrot.slane %v3959_v13, 5  ;;  %v3978_v28 = vrot.slane %v3960_v34, 4  ;;  %v3993_v29 = vld [vmem:[#allocation2 + $0x23] sm:$0x1]  ;;  %v3994_v31 = vld [vmem:[#allocation2 + $0x33] sm:$0x1]  ;;  %v4151_v33 = vsel %vm3911_vm7, %v4150_v12, %v4149_v25  ;;  %v3973_v38 = vsel %vm3899_vm3, %v3972_v20, %v3956_v39 }
 0x717   : > { %v3980_v41 = vrot.slane %v3961_v16, 3  ;;  %v3982_v42 = vrot.slane %v3962_v37, 2  ;;  %v3991_v43 = vld [vmem:[#allocation2 + $0x3] sm:$0x1]  ;;  %v3996_v45 = vld [vmem:[#allocation2 + $0x53] sm:$0x1]  ;;  %v4153_v47 = vsel %vm3914_vm8, %v4152_v35, %v4151_v33  ;;  %v3975_v48 = vsel %vm3902_vm4, %v3974_v22, %v3973_v38  ;;  %4122 = vrot.lane.b32.xlu1 %v4121_v46, %s5730_s29 }
 0x718   : > { %v3995_v44 = vld [vmem:[#allocation2 + $0x43] sm:$0x1]  ;;  %v3984_v49 = vrot.slane %v3963_v19, 1  ;;  %v3998_v51 = vld [vmem:[#allocation2 + $0x73] sm:$0x1]  ;;  %v4007_v52 = vrot.slane %v3992_v24, 7  ;;  %v4155_v53 = vsel %vm3917_vm9, %v4154_v36, %v4153_v47  ;;  %v3977_v54 = vsel %vm3905_vm5, %v3976_v26, %v3975_v48 }
 0x719   : > { %v3997_v50 = vld [vmem:[#allocation2 + $0x63] sm:$0x1]  ;;  %v4009_v55 = vrot.slane %v3993_v29, 6  ;;  %v4011_v56 = vrot.slane %v3994_v31, 5  ;;  %v4261_v10 = vld [vmem:[#allocation2 + $0x1b] sm:$0x1]  ;;  %4156 = vrot.lane.b32.xlu0 %v4155_v53, %s5732_s13  ;;  %v3979_v58 = vsel %vm3908_vm6, %v3978_v28, %v3977_v54 }
 0x71a   : > { %v4262_v57 = vld [vmem:[#allocation2 + $0x2b] sm:$0x1]  ;;  %v4008_v7 = vsel %vm3899_vm3, %v4007_v52, %v3991_v43  ;;  %v4013_v59 = vrot.slane %v3995_v44, 4  ;;  %v4015_v60 = vrot.slane %v3996_v45, 3  ;;  %v4263_v61 = vld [vmem:[#allocation2 + $0x3b] sm:$0x1]  ;;  %v3981_v2 = vsel %vm3911_vm7, %v3980_v41, %v3979_v58 }
 0x71b   : > { %v4264_v14 = vld [vmem:[#allocation2 + $0x4b] sm:$0x1]  ;;  %v4010_v62 = vsel %vm3902_vm4, %v4009_v55, %v4008_v7  ;;  %v4017_v18 = vrot.slane %v3997_v50, 2  ;;  %v4019_v0 = vrot.slane %v3998_v51, 1  ;;  %v4265_v3 = vld [vmem:[#allocation2 + $0x5b] sm:$0x1]  ;;  %v3983_v4 = vsel %vm3914_vm8, %v3982_v42, %v3981_v2 }
 0x71c   : > { %v4260_v1 = vld [vmem:[#allocation2 + $0xb] sm:$0x1]  ;;  %v4012_v5 = vsel %vm3905_vm5, %v4011_v56, %v4010_v62  ;;  %v4267_v21 = vld [vmem:[#allocation2 + $0x7b] sm:$0x1]  ;;  %v4276_v6 = vrot.slane %v4261_v10, 7  ;;  %v4278_v8 = vrot.slane %v4262_v57, 6  ;;  %v3985_v27 = vsel %vm3917_vm9, %v3984_v49, %v3983_v4 }
 0x71d   : > { %v4266_v23 = vld [vmem:[#allocation2 + $0x6b] sm:$0x1]  ;;  %v4395_v9 = vld [vmem:[#allocation2 + $0x1f] sm:$0x1]  ;;  %v4014_v11 = vsel %vm3908_vm6, %v4013_v59, %v4012_v5  ;;  %v4280_v63 = vrot.slane %v4263_v61, 5  ;;  %v4282_v30 = vrot.slane %v4264_v14, 4  ;;  %3986 = vrot.lane.b32.xlu1 %v3985_v27, %s5730_s29 }
 0x71e   : > { %v4396_v12 = vld [vmem:[#allocation2 + $0x2f] sm:$0x1]  ;;  %v4397_v13 = vld [vmem:[#allocation2 + $0x3f] sm:$0x1]  ;;  %v4016_v34 = vsel %vm3911_vm7, %v4015_v60, %v4014_v11  ;;  %v4277_v32 = vsel %vm3899_vm3, %v4276_v6, %v4260_v1  ;;  %v4284_v15 = vrot.slane %v4265_v3, 3  ;;  %v4286_v35 = vrot.slane %v4266_v23, 2 }
 0x71f   : > { %v4398_v36 = vld [vmem:[#allocation2 + $0x4f] sm:$0x1]  ;;  %v4399_v39 = vld [vmem:[#allocation2 + $0x5f] sm:$0x1]  ;;  %v4018_v16 = vsel %vm3914_vm8, %v4017_v18, %v4016_v34  ;;  %v4279_v37 = vsel %vm3902_vm4, %v4278_v8, %v4277_v32  ;;  %v4288_v40 = vrot.slane %v4267_v21, 1  ;;  %v4410_v20 = vrot.slane %v4395_v9, 7 }
 0x720   : > { %v4394_v17 = vld [vmem:[#allocation2 + $0xf] sm:$0x1]  ;;  %v4020_v22 = vsel %vm3917_vm9, %v4019_v0, %v4018_v16  ;;  %v4281_v24 = vsel %vm3905_vm5, %v4280_v63, %v4279_v37  ;;  %v4401_v46 = vld [vmem:[#allocation2 + $0x7f] sm:$0x1]  ;;  %v4412_v25 = vrot.slane %v4396_v12, 6  ;;  %v4414_v26 = vrot.slane %v4397_v13, 5 }
 0x721   : > { %v4400_v19 = vld [vmem:[#allocation2 + $0x6f] sm:$0x1]  ;;  %v4295_v28 = vld [vmem:[#allocation2 + $0x1c] sm:$0x1]  ;;  %4021 = vrot.lane.b32.xlu0 %v4020_v22, %s5732_s13  ;;  %v4283_v29 = vsel %vm3908_vm6, %v4282_v30, %v4281_v24  ;;  %v4411_v31 = vsel %vm3899_vm3, %v4410_v20, %v4394_v17  ;;  %v4416_v33 = vrot.slane %v4398_v36, 4  ;;  %v4418_v38 = vrot.slane %v4399_v39, 3 }
 0x722   : > { %v4296_v41 = vld [vmem:[#allocation2 + $0x2c] sm:$0x1]  ;;  %v4297_v42 = vld [vmem:[#allocation2 + $0x3c] sm:$0x1]  ;;  %v4285_v43 = vsel %vm3911_vm7, %v4284_v15, %v4283_v29  ;;  %v4413_v44 = vsel %vm3902_vm4, %v4412_v25, %v4411_v31  ;;  %v4420_v45 = vrot.slane %v4400_v19, 2  ;;  %v4482_v50 = vld [vmem:[%s6559_s10 + $0x190] sm:$0xff] }
 0x723   : > { %v4294_v47 = vld [vmem:[#allocation2 + $0xc] sm:$0x1]  ;;  %v4299_v49 = vld [vmem:[#allocation2 + $0x5c] sm:$0x1]  ;;  %v4436_v52 = vld [vmem:[%s6559_s10 + $0x20] sm:$0xff]  ;;  %v4287_v54 = vsel %vm3914_vm8, %v4286_v35, %v4285_v43  ;;  %v4415_v55 = vsel %vm3905_vm5, %v4414_v26, %v4413_v44  ;;  %v4422_v56 = vrot.slane %v4401_v46, 1 }
 0x724   : > { %v4298_v48 = vld [vmem:[#allocation2 + $0x4c] sm:$0x1]  ;;  %v4483_v51 = vld [vmem:[%s6559_s10 + $0x198] sm:$0xff]  ;;  %v4310_v57 = vrot.slane %v4295_v28, 7  ;;  %v4289_v7 = vsel %vm3917_vm9, %v4288_v40, %v4287_v54  ;;  %v4417_v59 = vsel %vm3908_vm6, %v4416_v33, %v4415_v55  ;;  %v4312_v60 = vrot.slane %v4296_v41, 6  ;;  %v4466_v14 = vld [vmem:[%s6559_s10 + $0x110] sm:$0xff] }
 0x725   : > { %v4437_v53 = vld [vmem:[%s6559_s10 + $0x28] sm:$0xff]  ;;  %v4301_v58 = vld [vmem:[#allocation2 + $0x7c] sm:$0x1]  ;;  %v4314_v61 = vrot.slane %v4297_v42, 5  ;;  %v4161_v62 = vld [vmem:[#allocation2 + $0x18] sm:$0x1]  ;;  %4290 = vrot.lane.b32.xlu1 %v4289_v7, %s5732_s13  ;;  %v4419_v18 = vsel %vm3911_vm7, %v4418_v38, %v4417_v59  ;;  %v5679_v30 = vpack.c.bf16 %v4483_v51, %v4482_v50 }
 0x726   : > { %v4300_v10 = vld [vmem:[#allocation2 + $0x6c] sm:$0x1]  ;;  %v4467_v2 = vld [vmem:[%s6559_s10 + $0x118] sm:$0xff]  ;;  %v4311_v0 = vsel %vm3899_vm3, %v4310_v57, %v4294_v47  ;;  %v4316_v1 = vrot.slane %v4298_v48, 4  ;;  %v4318_v3 = vrot.slane %v4299_v49, 3  ;;  %v4421_v5 = vsel %vm3914_vm8, %v4420_v45, %v4419_v18  ;;  %v4454_v24 = vld [vmem:[%s6559_s10 + $0xb0] sm:$0xff] }
 0x727   : > { %v4162_v23 = vld [vmem:[#allocation2 + $0x28] sm:$0x1]  ;;  %v4163_v4 = vld [vmem:[#allocation2 + $0x38] sm:$0x1]  ;;  %v4313_v21 = vsel %vm3902_vm4, %v4312_v60, %v4311_v0  ;;  %v4320_v6 = vrot.slane %v4300_v10, 2  ;;  %v4322_v8 = vrot.slane %v4301_v58, 1  ;;  %v4423_v11 = vsel %vm3917_vm9, %v4422_v56, %v4421_v5  ;;  %5680 = vmatprep.subr.bf16.mxu0 %v5679_v30 }
 0x728   : > { %v4164_v9 = vld [vmem:[#allocation2 + $0x48] sm:$0x1]  ;;  %v4165_v27 = vld [vmem:[#allocation2 + $0x58] sm:$0x1]  ;;  %v4315_v63 = vsel %vm3905_vm5, %v4314_v61, %v4313_v21  ;;  %v5653_v12 = vpack.c.bf16 %v4437_v53, %v4436_v52  ;;  %4424 = vrot.lane.b32.xlu0 %v4423_v11, %s5732_s13  ;;  %v5681_v35 = vpack.c.bf16 %v4467_v2, %v4466_v14  ;;  %v4176_v36 = vrot.slane %v4161_v62, 7  ;;  %v4484_v52 = vld [vmem:[%s6559_s10 + $0x1a0] sm:$0xff] }
 0x729   : > { %v4160_v13 = vld [vmem:[#allocation2 + $0x8] sm:$0x1]  ;;  %v4167_v32 = vld [vmem:[#allocation2 + $0x78] sm:$0x1]  ;;  %v4317_v15 = vsel %vm3908_vm6, %v4316_v1, %v4315_v63  ;;  %v4178_v39 = vrot.slane %v4162_v23, 6  ;;  %v4180_v17 = vrot.slane %v4163_v4, 5 }
 0x72a   : > { %v4166_v34 = vld [vmem:[#allocation2 + $0x68] sm:$0x1]  ;;  %v4027_v16 = vld [vmem:[#allocation2 + $0x14] sm:$0x1]  ;;  %v4028_v37 = vld [vmem:[#allocation2 + $0x24] sm:$0x1]  ;;  %v4319_v40 = vsel %vm3911_vm7, %v4318_v3, %v4317_v15  ;;  %5654 = vmatpush3.bf16.msra.mxu1 %v5653_v12  ;;  %5682 = vmatpush3.bf16.msra.mxu0 %v5681_v35  ;;  %v4177_v25 = vsel %vm3899_vm3, %v4176_v36, %v4160_v13 }
 0x72b   : > { %v4182_v19 = vrot.slane %v4164_v9, 4  ;;  %v4184_v20 = vrot.slane %v4165_v27, 3  ;;  %v4029_v22 = vld [vmem:[#allocation2 + $0x34] sm:$0x1]  ;;  %v4321_v46 = vsel %vm3914_vm8, %v4320_v6, %v4319_v40  ;;  %v4186_v26 = vrot.slane %v4166_v34, 2  ;;  %v4455_v51 = vld [vmem:[%s6559_s10 + $0xb8] sm:$0xff] }
 0x72c   : > { %v4188_v28 = vrot.slane %v4167_v32, 1  ;;  %v4026_v29 = vld [vmem:[#allocation2 + $0x4] sm:$0x1]  ;;  %v4031_v33 = vld [vmem:[#allocation2 + $0x54] sm:$0x1]  ;;  %v4323_v38 = vsel %vm3917_vm9, %v4322_v8, %v4321_v46  ;;  %v4179_v41 = vsel %vm3902_vm4, %v4178_v39, %v4177_v25  ;;  %v4042_v43 = vrot.slane %v4027_v16, 7 }
 0x72d   : > { %v4030_v31 = vld [vmem:[#allocation2 + $0x44] sm:$0x1]  ;;  %v4044_v44 = vrot.slane %v4028_v37, 6  ;;  %v4033_v45 = vld [vmem:[#allocation2 + $0x74] sm:$0x1]  ;;  %4325 = vst.msk [vmem:[#allocation3 + $0x18] sm:$0xff] %vm1962_vm2, %v4323_v38  ;;  %v4181_v47 = vsel %vm3905_vm5, %v4180_v17, %v4179_v41  ;;  %v5655_v61 = vpack.c.bf16 %v4455_v51, %v4454_v24 }
 0x72e   : > { %v4032_v42 = vld [vmem:[#allocation2 + $0x64] sm:$0x1]  ;;  %v4046_v48 = vrot.slane %v4029_v22, 5  ;;  %v4048_v49 = vrot.slane %v4030_v31, 4  ;;  %v4050_v50 = vrot.slane %v4031_v33, 3  ;;  %v4485_v53 = vld [vmem:[%s6559_s10 + $0x1a8] sm:$0xff]  ;;  %v4183_v54 = vsel %vm3908_vm6, %v4182_v19, %v4181_v47 }
 0x72f   : > { %v4043_v55 = vsel %vm3899_vm3, %v4042_v43, %v4026_v29  ;;  %v4052_v56 = vrot.slane %v4032_v42, 2  ;;  %v4054_v10 = vrot.slane %v4033_v45, 1  ;;  %v4438_v57 = vld [vmem:[%s6559_s10 + $0x30] sm:$0xff]  ;;  %v4439_v58 = vld [vmem:[%s6559_s10 + $0x38] sm:$0xff]  ;;  %v4468_v7 = vld [vmem:[%s6559_s10 + $0x120] sm:$0xff]  ;;  %v4185_v59 = vsel %vm3911_vm7, %v4184_v20, %v4183_v54  ;;  %5656 = vmatprep.subr.bf16.mxu1 %v5655_v61 }
 0x730   : > { %v4045_v60 = vsel %vm3902_vm4, %v4044_v44, %v4043_v55  ;;  %v5683_v14 = vpack.c.bf16 %v4485_v53, %v4484_v52  ;;  %v4469_v2 = vld [vmem:[%s6559_s10 + $0x128] sm:$0xff]  ;;  %v3883_v62 = vld [vmem:[#allocation2 + $0x10] sm:$0x1]  ;;  %v4187_v18 = vsel %vm3914_vm8, %v4186_v26, %v4185_v59  ;;  %v5657_v1 = vpack.c.bf16 %v4439_v58, %v4438_v57  ;;  %v3882_v23 = vld [vmem:[#allocation2] sm:$0x1] }
 0x731   : > { %v4047_v0 = vsel %vm3905_vm5, %v4046_v48, %v4045_v60  ;;  %v5685_v3 = vpack.c.bf16 %v4469_v2, %v4468_v7  ;;  %v3884_v4 = vld [vmem:[#allocation2 + $0x20] sm:$0x1]  ;;  %v3885_v5 = vld [vmem:[#allocation2 + $0x30] sm:$0x1]  ;;  %v4189_v6 = vsel %vm3917_vm9, %v4188_v28, %v4187_v18  ;;  %v3898_v11 = vrot.slane %v3883_v62, 7  ;;  %v4457_v39 = vld [vmem:[%s6559_s10 + $0xc8] sm:$0xff] }
 0x732   : > { %v3886_v21 = vld [vmem:[#allocation2 + $0x40] sm:$0x1]  ;;  %v4049_v8 = vsel %vm3908_vm6, %v4048_v49, %v4047_v0  ;;  %5684 = vmatprep.subr.bf16.mxu0 %v5683_v14  ;;  %v3887_v9 = vld [vmem:[#allocation2 + $0x50] sm:$0x1]  ;;  %4191 = vst.msk [vmem:[#allocation3 + $0x10] sm:$0xff] %vm1962_vm2, %v4189_v6  ;;  %5658 = vmatpush3.bf16.msra.mxu1 %v5657_v1  ;;  %v3901_v30 = vrot.slane %v3884_v4, 6 }
 0x733   : > { %v3888_v27 = vld [vmem:[#allocation2 + $0x60] sm:$0x1]  ;;  %v4051_v63 = vsel %vm3911_vm7, %v4050_v50, %v4049_v8  ;;  %5686 = vmatpush3.bf16.msra.mxu0 %v5685_v3  ;;  %v3904_v12 = vrot.slane %v3885_v5, 5  ;;  %v3907_v13 = vrot.slane %v3886_v21, 4  ;;  %v3889_v34 = vld [vmem:[#allocation2 + $0x70] sm:$0x1]  ;;  %v3900_v35 = vsel %vm3899_vm3, %v3898_v11, %v3882_v23 }
 0x734   : > { %v4456_v32 = vld [vmem:[%s6559_s10 + $0xc0] sm:$0xff]  ;;  %v4053_v15 = vsel %vm3914_vm8, %v4052_v56, %v4051_v63  ;;  %v3910_v36 = vrot.slane %v3887_v9, 3  ;;  %v4486_v16 = vld [vmem:[%s6559_s10 + $0x1b0] sm:$0xff]  ;;  %v4487_v37 = vld [vmem:[%s6559_s10 + $0x1b8] sm:$0xff]  ;;  %v3903_v17 = vsel %vm3902_vm4, %v3901_v30, %v3900_v35  ;;  %v3913_v19 = vrot.slane %v3888_v27, 2 }
 0x735   : > { %v4055_v40 = vsel %vm3917_vm9, %v4054_v10, %v4053_v15  ;;  %v5659_v20 = vpack.c.bf16 %v4457_v39, %v4456_v32  ;;  %v4440_v22 = vld [vmem:[%s6559_s10 + $0x40] sm:$0xff]  ;;  %v4441_v24 = vld [vmem:[%s6559_s10 + $0x48] sm:$0xff]  ;;  %v4470_v46 = vld [vmem:[%s6559_s10 + $0x130] sm:$0xff]  ;;  %v3906_v25 = vsel %vm3905_vm5, %v3904_v12, %v3903_v17  ;;  %v3916_v26 = vrot.slane %v3889_v34, 1 }
 0x736   : > { %4057 = vst.msk [vmem:[#allocation3 + $0x8] sm:$0xff] %vm1962_vm2, %v4055_v40  ;;  %v5687_v28 = vpack.c.bf16 %v4487_v37, %v4486_v16  ;;  %v5661_v29 = vpack.c.bf16 %v4441_v24, %v4440_v22  ;;  %v4471_v31 = vld [vmem:[%s6559_s10 + $0x138] sm:$0xff]  ;;  %v4458_v33 = vld [vmem:[%s6559_s10 + $0xd0] sm:$0xff]  ;;  %v3909_v41 = vsel %vm3908_vm6, %v3907_v13, %v3906_v25  ;;  %v4488_v44 = vld [vmem:[%s6559_s10 + $0x1c0] sm:$0xff] }
 0x737   : > { %v4459_v38 = vld [vmem:[%s6559_s10 + $0xd8] sm:$0xff]  ;;  %5660 = vmatprep.subr.bf16.mxu1 %v5659_v20  ;;  %v5689_v42 = vpack.c.bf16 %v4471_v31, %v4470_v46  ;;  %v4489_v45 = vld [vmem:[%s6559_s10 + $0x1c8] sm:$0xff]  ;;  %v4442_v47 = vld [vmem:[%s6559_s10 + $0x50] sm:$0xff]  ;;  %v3912_v48 = vsel %vm3911_vm7, %v3910_v36, %v3909_v41 }
 0x738   : > { %v5663_v43 = vpack.c.bf16 %v4459_v38, %v4458_v33  ;;  %5688 = vmatprep.subr.bf16.mxu0 %v5687_v28  ;;  %5662 = vmatpush3.bf16.msra.mxu1 %v5661_v29  ;;  %v5691_v49 = vpack.c.bf16 %v4489_v45, %v4488_v44  ;;  %v4443_v50 = vld [vmem:[%s6559_s10 + $0x58] sm:$0xff]  ;;  %v4472_v51 = vld [vmem:[%s6559_s10 + $0x140] sm:$0xff]  ;;  %v4473_v52 = vld [vmem:[%s6559_s10 + $0x148] sm:$0xff]  ;;  %v3915_v53 = vsel %vm3914_vm8, %v3913_v19, %v3912_v48 }
 0x739   : > { %5690 = vmatpush3.bf16.msra.mxu0 %v5689_v42  ;;  %v5665_v54 = vpack.c.bf16 %v4443_v50, %v4442_v47  ;;  %v5693_v55 = vpack.c.bf16 %v4473_v52, %v4472_v51  ;;  %v4460_v56 = vld [vmem:[%s6559_s10 + $0xe0] sm:$0xff]  ;;  %v4461_v10 = vld [vmem:[%s6559_s10 + $0xe8] sm:$0xff]  ;;  %v4490_v57 = vld [vmem:[%s6559_s10 + $0x1d0] sm:$0xff]  ;;  %v3918_v58 = vsel %vm3917_vm9, %v3916_v26, %v3915_v53 }
 0x73a   : > { %5664 = vmatprep.subr.bf16.mxu1 %v5663_v43  ;;  %5692 = vmatprep.subr.bf16.mxu0 %v5691_v49  ;;  %v5667_v7 = vpack.c.bf16 %v4461_v10, %v4460_v56  ;;  %v4491_v59 = vld [vmem:[%s6559_s10 + $0x1d8] sm:$0xff]  ;;  %v4444_v60 = vld [vmem:[%s6559_s10 + $0x60] sm:$0xff]  ;;  %v4445_v61 = vld [vmem:[%s6559_s10 + $0x68] sm:$0xff]  ;;  %3920 = vst.msk [vmem:[#allocation3] sm:$0xff] %vm1962_vm2, %v3918_v58 }
 0x73b   : > { %v5695_v14 = vpack.c.bf16 %v4491_v59, %v4490_v57  ;;  %v4474_v2 = vld [vmem:[%s6559_s10 + $0x150] sm:$0xff]  ;;  %v4475_v62 = vld [vmem:[%s6559_s10 + $0x158] sm:$0xff]  ;;  %v5669_v0 = vpack.c.bf16 %v4445_v61, %v4444_v60  ;;  %v4492_v3 = vld [vmem:[%s6559_s10 + $0x1e0] sm:$0xff] }
 0x73c   : > { %v4462_v18 = vld [vmem:[%s6559_s10 + $0xf0] sm:$0xff]  ;;  %5666 = vmatpush3.bf16.msra.mxu1 %v5665_v54  ;;  %v4463_v1 = vld [vmem:[%s6559_s10 + $0xf8] sm:$0xff]  ;;  %v4493_v23 = vld [vmem:[%s6559_s10 + $0x1e8] sm:$0xff]  ;;  %v5697_v4 = vpack.c.bf16 %v4475_v62, %v4474_v2 }
 0x73d   : > { %5694 = vmatpush3.bf16.msra.mxu0 %v5693_v55  ;;  %5668 = vmatprep.subr.bf16.mxu1 %v5667_v7  ;;  %v5671_v5 = vpack.c.bf16 %v4463_v1, %v4462_v18  ;;  %v4446_v21 = vld [vmem:[%s6559_s10 + $0x70] sm:$0xff]  ;;  %v4447_v6 = vld [vmem:[%s6559_s10 + $0x78] sm:$0xff]  ;;  %v5699_v8 = vpack.c.bf16 %v4493_v23, %v4492_v3  ;;  %v4476_v9 = vld [vmem:[%s6559_s10 + $0x160] sm:$0xff] }
 0x73e   : > { %5696 = vmatprep.subr.bf16.mxu0 %v5695_v14  ;;  %v4477_v27 = vld [vmem:[%s6559_s10 + $0x168] sm:$0xff]  ;;  %v4494_v11 = vld [vmem:[%s6559_s10 + $0x1f0] sm:$0xff]  ;;  %v4495_v63 = vld [vmem:[%s6559_s10 + $0x1f8] sm:$0xff]  ;;  %v5673_v30 = vpack.c.bf16 %v4447_v6, %v4446_v21 }
 0x73f   : > { %v5701_v12 = vpack.c.bf16 %v4477_v27, %v4476_v9  ;;  %v5703_v13 = vpack.c.bf16 %v4495_v63, %v4494_v11  ;;  %v4478_v34 = vld [vmem:[%s6559_s10 + $0x170] sm:$0xff]  ;;  %v4479_v32 = vld [vmem:[%s6559_s10 + $0x178] sm:$0xff]  ;;  %v4865_v41 = vld [vmem:[%s6560_s11] ss:$0 sm:$0xff] }
 0x740   : > { %5670 = vmatpush3.bf16.msra.mxu1 %v5669_v0  ;;  %v5705_v15 = vpack.c.bf16 %v4479_v32, %v4478_v34 }
 0x741   : > { %5698 = vmatpush3.bf16.msra.mxu0 %v5697_v4  ;;  %5672 = vmatprep.subr.bf16.mxu1 %v5671_v5 }
 0x742   : > { %5700 = vmatprep.subr.bf16.mxu0 %v5699_v8 }
 0x744   : > { %5674 = vmatpush3.bf16.msra.mxu1 %v5673_v30 }
 0x745   : > { %5702 = vmatpush3.bf16.msra.mxu0 %v5701_v12 }
 0x746   : > { %5704 = vmatprep.subr.bf16.mxu0 %v5703_v13 }
 0x749   : > { %5706 = vmatpush3.bf16.msra.mxu0 %v5705_v15 }
 0x77d   : > { %v4391_v35 = vpop.permute.xlu0 %4390  ;;  %v4357_v36 = vpop.permute.xlu1 %4356 }
 0x77e   : > { %4359 = vst.msk [vmem:[#allocation3 + $0x18] sm:$0xff] %vm3954_vm10, %v4357_v36 }
 0x77f   : > { %4393 = vst.msk [vmem:[#allocation3 + $0x18] sm:$0xff] %vm3989_vm11, %v4391_v35 }
 0x781   : > { %v4223_v39 = vpop.permute.xlu1 %4222  ;;  %v4089_v16 = vpop.permute.xlu0 %4088 }
 0x782   : > { %4225 = vst.msk [vmem:[#allocation3 + $0x10] sm:$0xff] %vm3954_vm10, %v4223_v39  ;;  %4091 = vst.msk [vmem:[#allocation3 + $0x8] sm:$0xff] %vm3954_vm10, %v4089_v16 }
 0x785   : > { %v4257_v37 = vpop.permute.xlu1 %4256  ;;  %v3952_v40 = vpop.permute.xlu0 %3951 }
 0x786   : > { %4259 = vst.msk [vmem:[#allocation3 + $0x10] sm:$0xff] %vm3989_vm11, %v4257_v37 }
 0x787   : > { %3955 = vst.msk [vmem:[#allocation3] sm:$0xff] %vm3954_vm10, %v3952_v40 }
 0x789   : > { %v4123_v17 = vpop.permute.xlu1 %4122 }
 0x78a   : > { %4125 = vst.msk [vmem:[#allocation3 + $0x8] sm:$0xff] %vm3989_vm11, %v4123_v17 }
 0x78b   : > { %v4157_v19 = vpop.permute.xlu0 %4156 }
 0x78c   : > { %4159 = vst.msk [vmem:[#allocation3 + $0x8] sm:$0xff] %vm4024_vm12, %v4157_v19 }
 0x78f   : > { %v3987_v20 = vpop.permute.xlu1 %3986 }
 0x790   : > { %3990 = vst.msk [vmem:[#allocation3] sm:$0xff] %vm3989_vm11, %v3987_v20 }
 0x793   : > { %v4022_v22 = vpop.permute.xlu0 %4021  ;;  %v4429_v24 = vld [vmem:[#allocation3 + $0x8] sm:$0xff] }
 0x794   : > { %4025 = vst.msk [vmem:[#allocation3] sm:$0xff] %vm4024_vm12, %v4022_v22  ;;  %4567 = vmatprep.mubr.f32.mxu1 %v4429_v24 }
 0x797   : > { %v4291_v46 = vpop.permute.xlu1 %4290 }
 0x798   : > { %4293 = vst.msk [vmem:[#allocation3 + $0x10] sm:$0xff] %vm4024_vm12, %v4291_v46 }
 0x79a   : > { %v4425_v25 = vpop.permute.xlu0 %4424 }
 0x79b   : > { %4427 = vst.msk [vmem:[#allocation3 + $0x18] sm:$0xff] %vm4024_vm12, %v4425_v25  ;;  %v4428_v26 = vld [vmem:[#allocation3] sm:$0xff] }
 0x79c   : > { %4568 = vmatmul.mubr.f32.vlgmr.msra.gmra.mrb[56].mxu1 %v4428_v26 }
 0x79f   : > { %v4430_v28 = vld [vmem:[#allocation3 + $0x10] sm:$0xff] }
 0x7a2   : > { %v4431_v29 = vld [vmem:[#allocation3 + $0x18] sm:$0xff] }
 0x7a3   : > { %4637 = vmatprep.mubr.f32.mxu0 %v4431_v29 }
 0x7a4   : > { %4638 = vmatmul.mubr.f32.vlgmr.msra.gmra.mrb[72].mxu0 %v4430_v28 }
 0x86f   : > { %v5107_v31 = vpop.f32.mrb[56].mxu1 }
 0x870   : > { %v5108_v33 = vpop.f32.mrb[57].mxu1 }
 0x871   : > { %v5109_v38 = vadd.f32 %v5108_v33, %v5107_v31 }
 0x873   : > { %v4570_v44 = vadd.f32 %v5109_v38, %v4865_v41 }
 0x877   : > { %v5142_v42 = vpop.f32.mrb[72].mxu0 }
 0x878   : > { %v5143_v43 = vpop.f32.mrb[73].mxu0 }
 0x879   : > { %v5144_v45 = vadd.f32 %v5143_v43, %v5142_v42 }
 0x87b   : > { %v4640_v47 = vadd.f32 %v5144_v45, %v4570_v44 }
 0x87d   : > { %4643 = vmax.xlane.f32.xlu0 %v4640_v47 }
 0x90a   : > { %v4644_v48 = vpop.xlane.xlu0 %4643 }
 0x90b   : > { %v4645_v49 = vsub.f32 %v4640_v47, %v4644_v48 }
 0x90d   : > { %v4646_v50 = vmul.f32 1.442695, %v4645_v49 }
 0x90f   : > { %5718 = vpow2.f32 %v4646_v50 }
 0x919   : > { %v5719_v51 = vpop.eup %5718 }
 0x91a   : > { %4648 = vadd.xlane.f32.xlu1 %v5719_v51 }
 0x9a7   : > { %v4649_v52 = vpop.xlane.xlu1 %4648 }
 0x9a8   : > { %5720 = vrcp.f32 %v4649_v52 }
 0x9b2   : > { %v5721_v53 = vpop.eup %5720 }
 0x9b3   : > { %v4651_v54 = vmul.f32 %v5721_v53, %v4649_v52 }
 0x9b5   : > { %v4652_v55 = vsub.f32 2.0, %v4651_v54 }
 0x9b7   : > { %v4653_v56 = vmul.f32 %v5721_v53, %v4652_v55 }
 0x9b9   : > { %v4654_v10 = vmul.f32 %v5719_v51, %v4653_v56 }
 0x9bb   : > { %4655 = vst [vmem:[%s441_s25] sm:$0xff] %v4654_v10 }
 0x9bc PF: > { %s22_s21 = sadd.s32 1, %s5728_s21  }
 0x9bd   : > { %p19_p5 = scmp.ge.s32.totalorder %s22_s21, 4  }
 0x9bf   :  { %21 = sbr.rel (!%p19_p5) target bundleno = 1 (0x1), region = 101 }

</bundles_post_ra>
